<compile_context>
chip_gen: v7x
topology: tpu7x:2x2x1
jax: 0.10.0
libtpu: 0.0.40
codegen_flags: <defaults>
</compile_context>

<pallas_src>
import functools

import jax
import jax.numpy as jnp
from jax.experimental import pallas as pl
from jax.experimental.pallas import tpu as pltpu

# Packed parameter column layout (C, 23):
#   0: bn_scale, 1: bn_shift, 2: conv1 bias, 3: conv2 bias, 4: layer_scale,
#   5..13: conv1 3x3 weights (row-major taps), 14..22: conv2 3x3 weights.
_NPAR = 23


def _spatial_mix_kernel(tok_ref, flat_ref, ftop_ref, fbot_ref, inf_ref,
                        par_ref, out_ref, acc_ref, y_ref, *, C, W, tile_h):
    """One (batch, M row-tile) per grid step.

    tok_ref : (1, C, N)        f32   tokens (resident across the M sweep)
    flat_ref: (1, N, tile_M)   bf16  flatten^T row tile
    ftop_ref: (1, N, 2W)       bf16  2-row halo above the tile (index-clamped)
    fbot_ref: (1, N, 2W)       bf16  2-row halo below the tile (index-clamped)
    inf_ref : (1, tile_M, N)   bf16  inflate^T row tile (reduction slice)
    par_ref : (C, 23)          f32   packed per-channel parameters
    out_ref : (1, C, N)        f32   (written at the last M step)
    acc_ref : (C, N)           f32   scratch: inflate partial-sum accumulator
    y_ref   : (C, N)           bf16  scratch: BN(tokens), cast once per batch
    """
    m = pl.program_id(1)
    num_m = pl.num_programs(1)
    tile_m = tile_h * W
    mmid = (tile_h + 2) * W          # conv1 rows kept: tile rows +/- 1

    p = par_ref[...]                 # read the packed params once
    bn_scale = p[:, 0:1]
    bn_shift = p[:, 1:2]
    b1 = p[:, 2:3]
    b2 = p[:, 3:4]
    ls = p[:, 4:5]
    w1 = p[:, 5:14]                  # (C, 9)
    w2 = p[:, 14:23]                 # (C, 9)

    @pl.when(m == 0)
    def _init():
        acc_ref[...] = jnp.zeros_like(acc_ref)
        # BN folded into per-channel affine; cast once to bf16 for the MXU.
        y_ref[...] = (tok_ref[0] * bn_scale + bn_shift).astype(y_ref.dtype)

    y = y_ref[...]                                               # (C, N) bf16

    # ---- flatten matmul for this row tile + 2-row halos (MXU, bf16 -> f32).
    r_main = jnp.dot(y, flat_ref[0], preferred_element_type=jnp.float32)
    r_top = jnp.dot(y, ftop_ref[0], preferred_element_type=jnp.float32)
    r_bot = jnp.dot(y, fbot_ref[0], preferred_element_type=jnp.float32)
    # Halo block indices are clamped at the image edges; zero the clamped
    # copies so the window carries the conv zero-padding rows instead.
    r_top = r_top * (m > 0).astype(jnp.float32)
    r_bot = r_bot * (m < num_m - 1).astype(jnp.float32)
    r_win = jnp.concatenate([r_top, r_main, r_bot], axis=1)   # (C,(tile_h+4)W)

    pow2_w = (W & (W - 1)) == 0

    def dwconv3x3(v, wmat, bias):
        """Depthwise 3x3 cross-correlation (PyTorch Conv2d, zero pad 1) on the
        flat (C, rows*W) layout: row taps are W-aligned lane slices, column
        taps are 1-lane slices with a lane-index boundary mask."""
        width = v.shape[1]
        lane = jax.lax.broadcasted_iota(jnp.int32, (1, width), 1)
        col = (lane & (W - 1)) if pow2_w else (lane % W)
        not_c0 = (col != 0).astype(jnp.float32)          # (1, width)
        not_cw = (col != W - 1).astype(jnp.float32)
        zc = jnp.zeros((C, 1), jnp.float32)
        zr = jnp.zeros((C, W), jnp.float32)
        # TODO(synk): these two 1-lane shifts could be pltpu.roll(+/-1)+mask to
        # put them on the XLU; kept as slices (direction-unambiguous, same masks).
        west = jnp.concatenate([zc, v[:, :-1]], axis=1) * not_c0   # v[., w-1]
        east = jnp.concatenate([v[:, 1:], zc], axis=1) * not_cw    # v[., w+1]
        cols = (west, v, east)
        acc = None
        for i in range(3):             # kernel row -> dr = i - 1
            for j in range(3):         # kernel col -> dc = j - 1
                t = cols[j]
                if i == 0:             # needs v[., h-1, .]
                    t = jnp.concatenate([zr, t[:, :-W]], axis=1)
                elif i == 2:           # needs v[., h+1, .]
                    t = jnp.concatenate([t[:, W:], zr], axis=1)
                term = wmat[:, i * 3 + j:i * 3 + j + 1] * t
                acc = term if acc is None else acc + term          # first-tap init
        return acc + bias

    # conv1 + ReLU over the halo window; keep rows [h0-1, h0+tile_h+1).
    a = jnp.maximum(dwconv3x3(r_win, w1, b1), 0.0)
    a = a[:, W:W + mmid]
    # Rows of `a` that fall outside the image are conv2 zero-padding rows (not
    # relu(conv1(pad))): zero them.  Only the first/last M step is affected.
    lane_mid = jax.lax.broadcasted_iota(jnp.int32, (1, mmid), 1)
    first_row = (lane_mid < W).astype(jnp.float32)
    last_row = (lane_mid >= mmid - W).astype(jnp.float32)
    drop = (first_row * (m == 0).astype(jnp.float32)
            + last_row * (m == num_m - 1).astype(jnp.float32))
    a = a * (1.0 - drop)

    # conv2; keep the tile's own rows, bf16 for the inflate stream.
    x = dwconv3x3(a, w2, b2)
    x_tile = x[:, W:W + tile_m].astype(jnp.bfloat16)             # (C, tile_M)

    # ---- inflate matmul partial sum over this M tile (MXU, bf16 -> f32).
    acc_ref[...] += jnp.dot(x_tile, inf_ref[0],
                            preferred_element_type=jnp.float32)

    @pl.when(m == num_m - 1)
    def _finalize():
        out_ref[0] = (tok_ref[0] + ls * acc_ref[...]).astype(out_ref.dtype)


def _choose_tile_h(H, W, N, C, budget_bytes):
    """Largest even divisor of H whose per-step working set fits the budget."""
    best = None
    for th in range(2, H + 1, 2):
        if H % th:
            continue
        tm = th * W
        mw = (th + 4) * W
        bytes_flat = N * tm * 2                     # bf16 flatten tile
        bytes_inf = tm * N * 2                      # bf16 inflate tile
        bytes_halo = 2 * (N * 2 * W) * 2            # two bf16 halos
        streams = 2 * (bytes_flat + bytes_inf + bytes_halo)   # double-buffered
        conv_live = 6 * C * mw * 4                  # f32 window intermediates
        resident = 3 * C * N * 4 + C * N * 2 + C * 128 * 4
        if streams + conv_live + resident <= budget_bytes:
            best = th
    return best


def spatial_mix_pallas(tokens, sp_flatten, sp_inflate, params, grid_shape,
                       eps=1e-5, tile_h=None,
                       vmem_limit_bytes=32 * 1024 * 1024):
    B, C, N = tokens.shape
    H, W = grid_shape
    M = H * W
    assert sp_flatten.shape == (B, M, N)
    assert sp_inflate.shape == (B, N, M)
    assert H % 2 == 0, "2-row halo blocks need an even H"  # TODO(synk): odd H

    if tile_h is None:
        tile_h = _choose_tile_h(H, W, N, C, budget_bytes=vmem_limit_bytes // 2)
        if tile_h is None:
            tile_h = 2
    assert H % tile_h == 0 and tile_h % 2 == 0, (H, tile_h)

    tile_m = tile_h * W
    num_m = H // tile_h
    r2 = tile_h // 2                    # halo-block stride in 2W-row blocks
    last_halo_blk = H // 2 - 1

    # --- glue: BatchNorm1d training-mode batch statistics, folded per channel.
    tok = tokens.astype(jnp.float32)
    mean = jnp.mean(tok, axis=(0, 2))
    var = jnp.mean((tok - mean[None, :, None]) ** 2, axis=(0, 2))
    bn_scale = params["bn_gamma"] / jnp.sqrt(var + eps)
    bn_shift = params["bn_beta"] - mean * bn_scale

    packed = jnp.concatenate([
        bn_scale.reshape(C, 1), bn_shift.reshape(C, 1),
        params["b1"].reshape(C, 1), params["b2"].reshape(C, 1),
        params["layer_scale"].reshape(C, 1),
        params["w1"].reshape(C, 9), params["w2"].reshape(C, 9),
    ], axis=1).astype(jnp.float32)
    assert packed.shape == (C, _NPAR)

    # --- stream layouts: contraction dims land on the RHS sublane axis (no
    #     per-step MXU transposes) and M-tiled DMA slices are contiguous.
    flat_t = jnp.swapaxes(sp_flatten, 1, 2).astype(jnp.bfloat16)   # (B, N, M)
    inf_t = jnp.swapaxes(sp_inflate, 1, 2).astype(jnp.bfloat16)    # (B, M, N)

    kernel = functools.partial(_spatial_mix_kernel, C=C, W=W, tile_h=tile_h)

    out = pl.pallas_call(
        kernel,
        out_shape=jax.ShapeDtypeStruct((B, C, N), jnp.float32),
        grid_spec=pltpu.PrefetchScalarGridSpec(
            num_scalar_prefetch=0,
            grid=(B, num_m),
            in_specs=[
                # tokens: resident across the whole M sweep of one batch elem
                pl.BlockSpec((1, C, N), lambda b, m: (b, 0, 0)),
                # flatten^T row tile of this step
                pl.BlockSpec((1, N, tile_m), lambda b, m: (b, 0, m)),
                # 2-row halos above / below (indices clamped at image edges;
                # the kernel zeroes the clamped copies)
                pl.BlockSpec((1, N, 2 * W),
                             lambda b, m: (b, 0, jnp.maximum(m * r2 - 1, 0))),
                pl.BlockSpec((1, N, 2 * W),
                             lambda b, m: (b, 0, jnp.minimum((m + 1) * r2,
                                                             last_halo_blk))),
                # inflate^T row tile (reduction slice of the second matmul)
                pl.BlockSpec((1, tile_m, N), lambda b, m: (b, m, 0)),
                # packed per-channel parameters
                pl.BlockSpec((C, _NPAR), lambda b, m: (0, 0)),
            ],
            out_specs=pl.BlockSpec((1, C, N), lambda b, m: (b, 0, 0)),
            scratch_shapes=[
                pltpu.VMEM((C, N), jnp.float32),    # inflate accumulator
                pltpu.VMEM((C, N), jnp.bfloat16),   # BN(tokens), cached
            ],
        ),
        compiler_params=pltpu.CompilerParams(
            # b independent (v7x megacore); m is the resident-accumulator sweep.
            # TODO(synk): if xprof shows a single busy core on v7x, switch to
            # pltpu.CORE_PARALLEL; add pipeline_mode=pl.Buffered(3) on the two
            # streamed specs if step-boundary DMA is still exposed.
            dimension_semantics=("parallel", "arbitrary"),
            vmem_limit_bytes=vmem_limit_bytes),
    )(tok, flat_t, flat_t, flat_t, inf_t, packed)
    return out


def spatial_mix_reference(tokens, sp_flatten, sp_inflate, params, grid_shape,
                          eps=1e-5):
    """Pure-JAX reference matching the PyTorch forward (training-mode BN)."""
    B, C, N = tokens.shape
    H, W = grid_shape
    x = tokens.astype(jnp.float32)
    mean = jnp.mean(x, axis=(0, 2))
    var = jnp.mean((x - mean[None, :, None]) ** 2, axis=(0, 2))
    y = (x - mean[None, :, None]) / jnp.sqrt(var + eps)[None, :, None]
    y = y * params["bn_gamma"][None, :, None] + params["bn_beta"][None, :, None]

    r = jnp.einsum("bmn,bcn->bcm", sp_flatten, y,
                   precision=jax.lax.Precision.HIGHEST)
    r = r.reshape(B, C, H, W)

    def dwconv(z, w, b):
        zp = jnp.pad(z, ((0, 0), (0, 0), (1, 1), (1, 1)))
        out = jnp.zeros_like(z)
        for dh in range(3):
            for dw_ in range(3):
                out = out + w[None, :, dh, dw_, None, None] * \
                      zp[:, :, dh:dh + H, dw_:dw_ + W]
        return out + b[None, :, None, None]

    r = jnp.maximum(dwconv(r, params["w1"], params["b1"]), 0.0)
    r = dwconv(r, params["w2"], params["b2"])
    r = r.reshape(B, C, H * W)
    r = jnp.einsum("bnm,bcm->bcn", sp_inflate, r,
                   precision=jax.lax.Precision.HIGHEST)
    return x + params["layer_scale"][None, :, None] * r


if __name__ == "__main__":
    B, C, N = 2, 8, 128
    H, W = 8, 128            # grid_shape; M = H*W = 1024
    M = H * W

    key = jax.random.PRNGKey(0)
    ks = jax.random.split(key, 10)
    tokens = jax.random.normal(ks[0], (B, C, N), jnp.float32)
    sp_flatten = 0.1 * jax.random.normal(ks[1], (B, M, N), jnp.float32)
    sp_inflate = 0.1 * jax.random.normal(ks[2], (B, N, M), jnp.float32)

    params = {
        "bn_gamma":    1.0 + 0.1 * jax.random.normal(ks[3], (C,), jnp.float32),
        "bn_beta":     0.1 * jax.random.normal(ks[4], (C,), jnp.float32),
        "w1":          0.2 * jax.random.normal(ks[5], (C, 3, 3), jnp.float32),
        "b1":          0.1 * jax.random.normal(ks[6], (C,), jnp.float32),
        "w2":          0.2 * jax.random.normal(ks[7], (C, 3, 3), jnp.float32),
        "b2":          0.1 * jax.random.normal(ks[8], (C,), jnp.float32),
        "layer_scale": 0.1 * jax.random.normal(ks[9], (C,), jnp.float32),
    }

    # tile_h=2 -> grid (B, 4): exercises the first / interior / last M tiles
    # (halo clamping + edge zero-padding paths) in one run.
    out = spatial_mix_pallas(tokens, sp_flatten, sp_inflate, params, (H, W),
                             tile_h=2)
    out = jax.block_until_ready(out)

    ref = spatial_mix_reference(tokens, sp_flatten, sp_inflate, params, (H, W))
    ref = jax.block_until_ready(ref)

    assert out.shape == (B, C, N)
    # Tolerance sized for bf16-streamed flatten/inflate matmuls (f32 accumulate).
    assert jnp.allclose(out, ref, atol=2e-2, rtol=2e-2), (
        "max abs diff %e" % float(jnp.max(jnp.abs(out - ref))))

    print("KERNEL_OK")
</pallas_src>

<mosaic_0001>
module attributes {stable_mosaic.version = 11 : i64} {
  func.func @_spatial_mix_kernel(%arg0: i32, %arg1: i32, %arg2: memref<1x8x128xf32, #tpu.memory_space<vmem>>, %arg3: memref<1x128x256xbf16, #tpu.memory_space<vmem>>, %arg4: memref<1x128x256xbf16, #tpu.memory_space<vmem>>, %arg5: memref<1x128x256xbf16, #tpu.memory_space<vmem>>, %arg6: memref<1x256x128xbf16, #tpu.memory_space<vmem>>, %arg7: memref<8x23xf32, #tpu.memory_space<vmem>>, %arg8: memref<1x8x128xf32, #tpu.memory_space<vmem>>, %arg9: memref<8x128xf32, #tpu.memory_space<vmem>>, %arg10: memref<8x128xbf16, #tpu.memory_space<vmem>>) attributes {dimension_semantics = [#tpu.dimension_semantics<parallel>, #tpu.dimension_semantics<arbitrary>], iteration_bounds = array<i64: 2, 4>, scalar_prefetch = 0 : i64, scratch_operands = 2 : i64, tpu.core_type = #tpu.core_type<tc>, window_params = [{transform_indices = @transform_0, window_bounds = array<i64: 1, 8, 128>}, {transform_indices = @transform_1, window_bounds = array<i64: 1, 128, 256>}, {transform_indices = @transform_2, window_bounds = array<i64: 1, 128, 256>}, {transform_indices = @transform_3, window_bounds = array<i64: 1, 128, 256>}, {transform_indices = @transform_4, window_bounds = array<i64: 1, 256, 128>}, {pipeline_mode = #tpu.pipeline_mode<synchronous>, transform_indices = @transform_5, window_bounds = array<i64: 8, 23>}, {transform_indices = @transform_6, window_bounds = array<i64: 1, 8, 128>}]} {
    %c0 = arith.constant 0 : index
    %c0_0 = arith.constant 0 : index
    %0 = vector.load %arg7[%c0, %c0_0] : memref<8x23xf32, #tpu.memory_space<vmem>>, vector<8x23xf32>
    %1 = vector.extract_strided_slice %0 {offsets = [0, 0], sizes = [8, 1], strides = [1, 1]} : vector<8x23xf32> to vector<8x1xf32>
    %2 = vector.extract_strided_slice %0 {offsets = [0, 1], sizes = [8, 1], strides = [1, 1]} : vector<8x23xf32> to vector<8x1xf32>
    %3 = vector.extract_strided_slice %0 {offsets = [0, 2], sizes = [8, 1], strides = [1, 1]} : vector<8x23xf32> to vector<8x1xf32>
    %4 = vector.extract_strided_slice %0 {offsets = [0, 3], sizes = [8, 1], strides = [1, 1]} : vector<8x23xf32> to vector<8x1xf32>
    %5 = vector.extract_strided_slice %0 {offsets = [0, 4], sizes = [8, 1], strides = [1, 1]} : vector<8x23xf32> to vector<8x1xf32>
    %6 = vector.extract_strided_slice %0 {offsets = [0, 5], sizes = [8, 9], strides = [1, 1]} : vector<8x23xf32> to vector<8x9xf32>
    %7 = vector.extract_strided_slice %0 {offsets = [0, 14], sizes = [8, 9], strides = [1, 1]} : vector<8x23xf32> to vector<8x9xf32>
    %c0_i32 = arith.constant 0 : i32
    %8 = arith.cmpi eq, %arg1, %c0_i32 : i32
    %9 = arith.extui %8 : i1 to i32
    %c0_i32_1 = arith.constant 0 : i32
    %10 = arith.cmpi ne, %9, %c0_i32_1 : i32
    scf.if %10 {
      %cst_39 = arith.constant 0.000000e+00 : f32
      %210 = vector.broadcast %cst_39 : f32 to vector<8x128xf32>
      %c0_40 = arith.constant 0 : index
      %c0_41 = arith.constant 0 : index
      %211 = vector.load %arg9[%c0_40, %c0_41] : memref<8x128xf32, #tpu.memory_space<vmem>>, vector<8x128xf32>
      tpu.vector_store %arg9[%c0_40, %c0_41], %210 {strides = array<i32>} : memref<8x128xf32, #tpu.memory_space<vmem>>, vector<8x128xf32>,
      %c0_42 = arith.constant 0 : index
      %c0_43 = arith.constant 0 : index
      %c0_44 = arith.constant 0 : index
      %212 = vector.load %arg2[%c0_42, %c0_43, %c0_44] : memref<1x8x128xf32, #tpu.memory_space<vmem>>, vector<1x8x128xf32>
      %213 = vector.shape_cast %212 : vector<1x8x128xf32> to vector<8x128xf32>
      %214 = vector.broadcast %1 : vector<8x1xf32> to vector<8x128xf32>
      %215 = arith.mulf %213, %214 : vector<8x128xf32>
      %216 = vector.broadcast %2 : vector<8x1xf32> to vector<8x128xf32>
      %217 = arith.addf %215, %216 : vector<8x128xf32>
      %218 = arith.truncf %217 : vector<8x128xf32> to vector<8x128xbf16>
      %c0_45 = arith.constant 0 : index
      %c0_46 = arith.constant 0 : index
      %219 = vector.load %arg10[%c0_45, %c0_46] : memref<8x128xbf16, #tpu.memory_space<vmem>>, vector<8x128xbf16>
      tpu.vector_store %arg10[%c0_45, %c0_46], %218 {strides = array<i32>} : memref<8x128xbf16, #tpu.memory_space<vmem>>, vector<8x128xbf16>,
    } else {
    }
    %c0_2 = arith.constant 0 : index
    %c0_3 = arith.constant 0 : index
    %11 = vector.load %arg10[%c0_2, %c0_3] : memref<8x128xbf16, #tpu.memory_space<vmem>>, vector<8x128xbf16>
    %c0_4 = arith.constant 0 : index
    %c0_5 = arith.constant 0 : index
    %c0_6 = arith.constant 0 : index
    %12 = vector.load %arg3[%c0_4, %c0_5, %c0_6] : memref<1x128x256xbf16, #tpu.memory_space<vmem>>, vector<1x128x256xbf16>
    %13 = vector.shape_cast %12 : vector<1x128x256xbf16> to vector<128x256xbf16>
    %cst = arith.constant dense<0.000000e+00> : vector<8x256xf32>
    %14 = tpu.matmul %11, %13, %cst {dimension_numbers = #tpu.dot_dimension_numbers<[1], [0], [0], [1], [0, 0, 1, 1], [], []>} : vector<8x128xbf16>, vector<128x256xbf16>, vector<8x256xf32> -> vector<8x256xf32>
    %c0_7 = arith.constant 0 : index
    %c0_8 = arith.constant 0 : index
    %c0_9 = arith.constant 0 : index
    %15 = vector.load %arg4[%c0_7, %c0_8, %c0_9] : memref<1x128x256xbf16, #tpu.memory_space<vmem>>, vector<1x128x256xbf16>
    %16 = vector.shape_cast %15 : vector<1x128x256xbf16> to vector<128x256xbf16>
    %cst_10 = arith.constant dense<0.000000e+00> : vector<8x256xf32>
    %17 = tpu.matmul %11, %16, %cst_10 {dimension_numbers = #tpu.dot_dimension_numbers<[1], [0], [0], [1], [0, 0, 1, 1], [], []>} : vector<8x128xbf16>, vector<128x256xbf16>, vector<8x256xf32> -> vector<8x256xf32>
    %c0_11 = arith.constant 0 : index
    %c0_12 = arith.constant 0 : index
    %c0_13 = arith.constant 0 : index
    %18 = vector.load %arg5[%c0_11, %c0_12, %c0_13] : memref<1x128x256xbf16, #tpu.memory_space<vmem>>, vector<1x128x256xbf16>
    %19 = vector.shape_cast %18 : vector<1x128x256xbf16> to vector<128x256xbf16>
    %cst_14 = arith.constant dense<0.000000e+00> : vector<8x256xf32>
    %20 = tpu.matmul %11, %19, %cst_14 {dimension_numbers = #tpu.dot_dimension_numbers<[1], [0], [0], [1], [0, 0, 1, 1], [], []>} : vector<8x128xbf16>, vector<128x256xbf16>, vector<8x256xf32> -> vector<8x256xf32>
    %c0_i32_15 = arith.constant 0 : i32
    %21 = arith.cmpi sgt, %arg1, %c0_i32_15 : i32
    %22 = arith.extui %21 : i1 to i32
    %23 = arith.sitofp %22 : i32 to f32
    %24 = vector.broadcast %23 : f32 to vector<8x256xf32>
    %25 = arith.mulf %17, %24 : vector<8x256xf32>
    %c3_i32 = arith.constant 3 : i32
    %26 = arith.cmpi slt, %arg1, %c3_i32 : i32
    %27 = arith.extui %26 : i1 to i32
    %28 = arith.sitofp %27 : i32 to f32
    %29 = vector.broadcast %28 : f32 to vector<8x256xf32>
    %30 = arith.mulf %20, %29 : vector<8x256xf32>
    %31 = tpu.concatenate %25, %14, %30 in 1 : vector<8x256xf32>, vector<8x256xf32>, vector<8x256xf32> -> vector<8x768xf32>
    %32 = tpu.iota {dimensions = array<i32: 1>} : vector<1x768xi32>
    %c127_i32 = arith.constant 127 : i32
    %33 = vector.broadcast %c127_i32 : i32 to vector<1x768xi32>
    %34 = arith.andi %32, %33 : vector<1x768xi32>
    %c0_i32_16 = arith.constant 0 : i32
    %35 = vector.broadcast %c0_i32_16 : i32 to vector<1x768xi32>
    %36 = arith.cmpi ne, %34, %35 : vector<1x768xi32>
    %37 = arith.extui %36 : vector<1x768xi1> to vector<1x768xi32>
    %38 = arith.sitofp %37 : vector<1x768xi32> to vector<1x768xf32>
    %c127_i32_17 = arith.constant 127 : i32
    %39 = vector.broadcast %c127_i32_17 : i32 to vector<1x768xi32>
    %40 = arith.cmpi ne, %34, %39 : vector<1x768xi32>
    %41 = arith.extui %40 : vector<1x768xi1> to vector<1x768xi32>
    %42 = arith.sitofp %41 : vector<1x768xi32> to vector<1x768xf32>
    %cst_18 = arith.constant 0.000000e+00 : f32
    %43 = vector.broadcast %cst_18 : f32 to vector<8x1xf32>
    %cst_19 = arith.constant 0.000000e+00 : f32
    %44 = vector.broadcast %cst_19 : f32 to vector<8x128xf32>
    %45 = vector.extract_strided_slice %31 {offsets = [0, 0], sizes = [8, 767], strides = [1, 1]} : vector<8x768xf32> to vector<8x767xf32>
    %46 = tpu.concatenate %43, %45 in 1 : vector<8x1xf32>, vector<8x767xf32> -> vector<8x768xf32>
    %47 = vector.broadcast %38 : vector<1x768xf32> to vector<8x768xf32>
    %48 = arith.mulf %46, %47 : vector<8x768xf32>
    %49 = vector.extract_strided_slice %31 {offsets = [0, 1], sizes = [8, 767], strides = [1, 1]} : vector<8x768xf32> to vector<8x767xf32>
    %50 = tpu.concatenate %49, %43 in 1 : vector<8x767xf32>, vector<8x1xf32> -> vector<8x768xf32>
    %51 = vector.broadcast %42 : vector<1x768xf32> to vector<8x768xf32>
    %52 = arith.mulf %50, %51 : vector<8x768xf32>
    %53 = vector.extract_strided_slice %48 {offsets = [0, 0], sizes = [8, 640], strides = [1, 1]} : vector<8x768xf32> to vector<8x640xf32>
    %54 = tpu.concatenate %44, %53 in 1 : vector<8x128xf32>, vector<8x640xf32> -> vector<8x768xf32>
    %55 = vector.extract_strided_slice %6 {offsets = [0, 0], sizes = [8, 1], strides = [1, 1]} : vector<8x9xf32> to vector<8x1xf32>
    %56 = vector.broadcast %55 : vector<8x1xf32> to vector<8x768xf32>
    %57 = arith.mulf %56, %54 : vector<8x768xf32>
    %58 = vector.extract_strided_slice %31 {offsets = [0, 0], sizes = [8, 640], strides = [1, 1]} : vector<8x768xf32> to vector<8x640xf32>
    %59 = tpu.concatenate %44, %58 in 1 : vector<8x128xf32>, vector<8x640xf32> -> vector<8x768xf32>
    %60 = vector.extract_strided_slice %6 {offsets = [0, 1], sizes = [8, 1], strides = [1, 1]} : vector<8x9xf32> to vector<8x1xf32>
    %61 = vector.broadcast %60 : vector<8x1xf32> to vector<8x768xf32>
    %62 = arith.mulf %61, %59 : vector<8x768xf32>
    %63 = arith.addf %57, %62 : vector<8x768xf32>
    %64 = vector.extract_strided_slice %52 {offsets = [0, 0], sizes = [8, 640], strides = [1, 1]} : vector<8x768xf32> to vector<8x640xf32>
    %65 = tpu.concatenate %44, %64 in 1 : vector<8x128xf32>, vector<8x640xf32> -> vector<8x768xf32>
    %66 = vector.extract_strided_slice %6 {offsets = [0, 2], sizes = [8, 1], strides = [1, 1]} : vector<8x9xf32> to vector<8x1xf32>
    %67 = vector.broadcast %66 : vector<8x1xf32> to vector<8x768xf32>
    %68 = arith.mulf %67, %65 : vector<8x768xf32>
    %69 = arith.addf %63, %68 : vector<8x768xf32>
    %70 = vector.extract_strided_slice %6 {offsets = [0, 3], sizes = [8, 1], strides = [1, 1]} : vector<8x9xf32> to vector<8x1xf32>
    %71 = vector.broadcast %70 : vector<8x1xf32> to vector<8x768xf32>
    %72 = arith.mulf %71, %48 : vector<8x768xf32>
    %73 = arith.addf %69, %72 : vector<8x768xf32>
    %74 = vector.extract_strided_slice %6 {offsets = [0, 4], sizes = [8, 1], strides = [1, 1]} : vector<8x9xf32> to vector<8x1xf32>
    %75 = vector.broadcast %74 : vector<8x1xf32> to vector<8x768xf32>
    %76 = arith.mulf %75, %31 : vector<8x768xf32>
    %77 = arith.addf %73, %76 : vector<8x768xf32>
    %78 = vector.extract_strided_slice %6 {offsets = [0, 5], sizes = [8, 1], strides = [1, 1]} : vector<8x9xf32> to vector<8x1xf32>
    %79 = vector.broadcast %78 : vector<8x1xf32> to vector<8x768xf32>
    %80 = arith.mulf %79, %52 : vector<8x768xf32>
    %81 = arith.addf %77, %80 : vector<8x768xf32>
    %82 = vector.extract_strided_slice %48 {offsets = [0, 128], sizes = [8, 640], strides = [1, 1]} : vector<8x768xf32> to vector<8x640xf32>
    %83 = tpu.concatenate %82, %44 in 1 : vector<8x640xf32>, vector<8x128xf32> -> vector<8x768xf32>
    %84 = vector.extract_strided_slice %6 {offsets = [0, 6], sizes = [8, 1], strides = [1, 1]} : vector<8x9xf32> to vector<8x1xf32>
    %85 = vector.broadcast %84 : vector<8x1xf32> to vector<8x768xf32>
    %86 = arith.mulf %85, %83 : vector<8x768xf32>
    %87 = arith.addf %81, %86 : vector<8x768xf32>
    %88 = vector.extract_strided_slice %31 {offsets = [0, 128], sizes = [8, 640], strides = [1, 1]} : vector<8x768xf32> to vector<8x640xf32>
    %89 = tpu.concatenate %88, %44 in 1 : vector<8x640xf32>, vector<8x128xf32> -> vector<8x768xf32>
    %90 = vector.extract_strided_slice %6 {offsets = [0, 7], sizes = [8, 1], strides = [1, 1]} : vector<8x9xf32> to vector<8x1xf32>
    %91 = vector.broadcast %90 : vector<8x1xf32> to vector<8x768xf32>
    %92 = arith.mulf %91, %89 : vector<8x768xf32>
    %93 = arith.addf %87, %92 : vector<8x768xf32>
    %94 = vector.extract_strided_slice %52 {offsets = [0, 128], sizes = [8, 640], strides = [1, 1]} : vector<8x768xf32> to vector<8x640xf32>
    %95 = tpu.concatenate %94, %44 in 1 : vector<8x640xf32>, vector<8x128xf32> -> vector<8x768xf32>
    %96 = vector.extract_strided_slice %6 {offsets = [0, 8], sizes = [8, 1], strides = [1, 1]} : vector<8x9xf32> to vector<8x1xf32>
    %97 = vector.broadcast %96 : vector<8x1xf32> to vector<8x768xf32>
    %98 = arith.mulf %97, %95 : vector<8x768xf32>
    %99 = arith.addf %93, %98 : vector<8x768xf32>
    %100 = vector.broadcast %3 : vector<8x1xf32> to vector<8x768xf32>
    %101 = arith.addf %99, %100 : vector<8x768xf32>
    %cst_20 = arith.constant 0.000000e+00 : f32
    %102 = vector.broadcast %cst_20 : f32 to vector<8x768xf32>
    %103 = arith.maximumf %101, %102 : vector<8x768xf32>
    %104 = vector.extract_strided_slice %103 {offsets = [0, 128], sizes = [8, 512], strides = [1, 1]} : vector<8x768xf32> to vector<8x512xf32>
    %105 = tpu.iota {dimensions = array<i32: 1>} : vector<1x512xi32>
    %c128_i32 = arith.constant 128 : i32
    %106 = vector.broadcast %c128_i32 : i32 to vector<1x512xi32>
    %107 = arith.cmpi slt, %105, %106 : vector<1x512xi32>
    %108 = arith.extui %107 : vector<1x512xi1> to vector<1x512xi32>
    %109 = arith.sitofp %108 : vector<1x512xi32> to vector<1x512xf32>
    %c384_i32 = arith.constant 384 : i32
    %110 = vector.broadcast %c384_i32 : i32 to vector<1x512xi32>
    %111 = arith.cmpi sge, %105, %110 : vector<1x512xi32>
    %112 = arith.extui %111 : vector<1x512xi1> to vector<1x512xi32>
    %113 = arith.sitofp %112 : vector<1x512xi32> to vector<1x512xf32>
    %c0_i32_21 = arith.constant 0 : i32
    %114 = arith.cmpi eq, %arg1, %c0_i32_21 : i32
    %115 = arith.extui %114 : i1 to i32
    %116 = arith.sitofp %115 : i32 to f32
    %117 = vector.broadcast %116 : f32 to vector<1x512xf32>
    %118 = arith.mulf %109, %117 : vector<1x512xf32>
    %c3_i32_22 = arith.constant 3 : i32
    %119 = arith.cmpi eq, %arg1, %c3_i32_22 : i32
    %120 = arith.extui %119 : i1 to i32
    %121 = arith.sitofp %120 : i32 to f32
    %122 = vector.broadcast %121 : f32 to vector<1x512xf32>
    %123 = arith.mulf %113, %122 : vector<1x512xf32>
    %124 = arith.addf %118, %123 : vector<1x512xf32>
    %cst_23 = arith.constant 1.000000e+00 : f32
    %125 = vector.broadcast %cst_23 : f32 to vector<1x512xf32>
    %126 = arith.subf %125, %124 : vector<1x512xf32>
    %127 = vector.broadcast %126 : vector<1x512xf32> to vector<8x512xf32>
    %128 = arith.mulf %104, %127 : vector<8x512xf32>
    %129 = tpu.iota {dimensions = array<i32: 1>} : vector<1x512xi32>
    %c127_i32_24 = arith.constant 127 : i32
    %130 = vector.broadcast %c127_i32_24 : i32 to vector<1x512xi32>
    %131 = arith.andi %129, %130 : vector<1x512xi32>
    %c0_i32_25 = arith.constant 0 : i32
    %132 = vector.broadcast %c0_i32_25 : i32 to vector<1x512xi32>
    %133 = arith.cmpi ne, %131, %132 : vector<1x512xi32>
    %134 = arith.extui %133 : vector<1x512xi1> to vector<1x512xi32>
    %135 = arith.sitofp %134 : vector<1x512xi32> to vector<1x512xf32>
    %c127_i32_26 = arith.constant 127 : i32
    %136 = vector.broadcast %c127_i32_26 : i32 to vector<1x512xi32>
    %137 = arith.cmpi ne, %131, %136 : vector<1x512xi32>
    %138 = arith.extui %137 : vector<1x512xi1> to vector<1x512xi32>
    %139 = arith.sitofp %138 : vector<1x512xi32> to vector<1x512xf32>
    %cst_27 = arith.constant 0.000000e+00 : f32
    %140 = vector.broadcast %cst_27 : f32 to vector<8x1xf32>
    %cst_28 = arith.constant 0.000000e+00 : f32
    %141 = vector.broadcast %cst_28 : f32 to vector<8x128xf32>
    %142 = vector.extract_strided_slice %128 {offsets = [0, 0], sizes = [8, 511], strides = [1, 1]} : vector<8x512xf32> to vector<8x511xf32>
    %143 = tpu.concatenate %140, %142 in 1 : vector<8x1xf32>, vector<8x511xf32> -> vector<8x512xf32>
    %144 = vector.broadcast %135 : vector<1x512xf32> to vector<8x512xf32>
    %145 = arith.mulf %143, %144 : vector<8x512xf32>
    %146 = vector.extract_strided_slice %128 {offsets = [0, 1], sizes = [8, 511], strides = [1, 1]} : vector<8x512xf32> to vector<8x511xf32>
    %147 = tpu.concatenate %146, %140 in 1 : vector<8x511xf32>, vector<8x1xf32> -> vector<8x512xf32>
    %148 = vector.broadcast %139 : vector<1x512xf32> to vector<8x512xf32>
    %149 = arith.mulf %147, %148 : vector<8x512xf32>
    %150 = vector.extract_strided_slice %145 {offsets = [0, 0], sizes = [8, 384], strides = [1, 1]} : vector<8x512xf32> to vector<8x384xf32>
    %151 = tpu.concatenate %141, %150 in 1 : vector<8x128xf32>, vector<8x384xf32> -> vector<8x512xf32>
    %152 = vector.extract_strided_slice %7 {offsets = [0, 0], sizes = [8, 1], strides = [1, 1]} : vector<8x9xf32> to vector<8x1xf32>
    %153 = vector.broadcast %152 : vector<8x1xf32> to vector<8x512xf32>
    %154 = arith.mulf %153, %151 : vector<8x512xf32>
    %155 = vector.extract_strided_slice %128 {offsets = [0, 0], sizes = [8, 384], strides = [1, 1]} : vector<8x512xf32> to vector<8x384xf32>
    %156 = tpu.concatenate %141, %155 in 1 : vector<8x128xf32>, vector<8x384xf32> -> vector<8x512xf32>
    %157 = vector.extract_strided_slice %7 {offsets = [0, 1], sizes = [8, 1], strides = [1, 1]} : vector<8x9xf32> to vector<8x1xf32>
    %158 = vector.broadcast %157 : vector<8x1xf32> to vector<8x512xf32>
    %159 = arith.mulf %158, %156 : vector<8x512xf32>
    %160 = arith.addf %154, %159 : vector<8x512xf32>
    %161 = vector.extract_strided_slice %149 {offsets = [0, 0], sizes = [8, 384], strides = [1, 1]} : vector<8x512xf32> to vector<8x384xf32>
    %162 = tpu.concatenate %141, %161 in 1 : vector<8x128xf32>, vector<8x384xf32> -> vector<8x512xf32>
    %163 = vector.extract_strided_slice %7 {offsets = [0, 2], sizes = [8, 1], strides = [1, 1]} : vector<8x9xf32> to vector<8x1xf32>
    %164 = vector.broadcast %163 : vector<8x1xf32> to vector<8x512xf32>
    %165 = arith.mulf %164, %162 : vector<8x512xf32>
    %166 = arith.addf %160, %165 : vector<8x512xf32>
    %167 = vector.extract_strided_slice %7 {offsets = [0, 3], sizes = [8, 1], strides = [1, 1]} : vector<8x9xf32> to vector<8x1xf32>
    %168 = vector.broadcast %167 : vector<8x1xf32> to vector<8x512xf32>
    %169 = arith.mulf %168, %145 : vector<8x512xf32>
    %170 = arith.addf %166, %169 : vector<8x512xf32>
    %171 = vector.extract_strided_slice %7 {offsets = [0, 4], sizes = [8, 1], strides = [1, 1]} : vector<8x9xf32> to vector<8x1xf32>
    %172 = vector.broadcast %171 : vector<8x1xf32> to vector<8x512xf32>
    %173 = arith.mulf %172, %128 : vector<8x512xf32>
    %174 = arith.addf %170, %173 : vector<8x512xf32>
    %175 = vector.extract_strided_slice %7 {offsets = [0, 5], sizes = [8, 1], strides = [1, 1]} : vector<8x9xf32> to vector<8x1xf32>
    %176 = vector.broadcast %175 : vector<8x1xf32> to vector<8x512xf32>
    %177 = arith.mulf %176, %149 : vector<8x512xf32>
    %178 = arith.addf %174, %177 : vector<8x512xf32>
    %179 = vector.extract_strided_slice %145 {offsets = [0, 128], sizes = [8, 384], strides = [1, 1]} : vector<8x512xf32> to vector<8x384xf32>
    %180 = tpu.concatenate %179, %141 in 1 : vector<8x384xf32>, vector<8x128xf32> -> vector<8x512xf32>
    %181 = vector.extract_strided_slice %7 {offsets = [0, 6], sizes = [8, 1], strides = [1, 1]} : vector<8x9xf32> to vector<8x1xf32>
    %182 = vector.broadcast %181 : vector<8x1xf32> to vector<8x512xf32>
    %183 = arith.mulf %182, %180 : vector<8x512xf32>
    %184 = arith.addf %178, %183 : vector<8x512xf32>
    %185 = vector.extract_strided_slice %128 {offsets = [0, 128], sizes = [8, 384], strides = [1, 1]} : vector<8x512xf32> to vector<8x384xf32>
    %186 = tpu.concatenate %185, %141 in 1 : vector<8x384xf32>, vector<8x128xf32> -> vector<8x512xf32>
    %187 = vector.extract_strided_slice %7 {offsets = [0, 7], sizes = [8, 1], strides = [1, 1]} : vector<8x9xf32> to vector<8x1xf32>
    %188 = vector.broadcast %187 : vector<8x1xf32> to vector<8x512xf32>
    %189 = arith.mulf %188, %186 : vector<8x512xf32>
    %190 = arith.addf %184, %189 : vector<8x512xf32>
    %191 = vector.extract_strided_slice %149 {offsets = [0, 128], sizes = [8, 384], strides = [1, 1]} : vector<8x512xf32> to vector<8x384xf32>
    %192 = tpu.concatenate %191, %141 in 1 : vector<8x384xf32>, vector<8x128xf32> -> vector<8x512xf32>
    %193 = vector.extract_strided_slice %7 {offsets = [0, 8], sizes = [8, 1], strides = [1, 1]} : vector<8x9xf32> to vector<8x1xf32>
    %194 = vector.broadcast %193 : vector<8x1xf32> to vector<8x512xf32>
    %195 = arith.mulf %194, %192 : vector<8x512xf32>
    %196 = arith.addf %190, %195 : vector<8x512xf32>
    %197 = vector.broadcast %4 : vector<8x1xf32> to vector<8x512xf32>
    %198 = arith.addf %196, %197 : vector<8x512xf32>
    %199 = vector.extract_strided_slice %198 {offsets = [0, 128], sizes = [8, 256], strides = [1, 1]} : vector<8x512xf32> to vector<8x256xf32>
    %200 = arith.truncf %199 : vector<8x256xf32> to vector<8x256xbf16>
    %c0_29 = arith.constant 0 : index
    %c0_30 = arith.constant 0 : index
    %201 = vector.load %arg9[%c0_29, %c0_30] : memref<8x128xf32, #tpu.memory_space<vmem>>, vector<8x128xf32>
    %c0_31 = arith.constant 0 : index
    %c0_32 = arith.constant 0 : index
    %c0_33 = arith.constant 0 : index
    %202 = vector.load %arg6[%c0_31, %c0_32, %c0_33] : memref<1x256x128xbf16, #tpu.memory_space<vmem>>, vector<1x256x128xbf16>
    %203 = vector.shape_cast %202 : vector<1x256x128xbf16> to vector<256x128xbf16>
    %cst_34 = arith.constant dense<0.000000e+00> : vector<8x128xf32>
    %204 = tpu.matmul %200, %203, %cst_34 {dimension_numbers = #tpu.dot_dimension_numbers<[1], [0], [0], [1], [0, 0, 1, 1], [], []>} : vector<8x256xbf16>, vector<256x128xbf16>, vector<8x128xf32> -> vector<8x128xf32>
    %205 = arith.addf %201, %204 : vector<8x128xf32>
    %c0_35 = arith.constant 0 : index
    %c0_36 = arith.constant 0 : index
    %206 = vector.load %arg9[%c0_35, %c0_36] : memref<8x128xf32, #tpu.memory_space<vmem>>, vector<8x128xf32>
    tpu.vector_store %arg9[%c0_35, %c0_36], %205 {strides = array<i32>} : memref<8x128xf32, #tpu.memory_space<vmem>>, vector<8x128xf32>,
    %c3_i32_37 = arith.constant 3 : i32
    %207 = arith.cmpi eq, %arg1, %c3_i32_37 : i32
    %208 = arith.extui %207 : i1 to i32
    %c0_i32_38 = arith.constant 0 : i32
    %209 = arith.cmpi ne, %208, %c0_i32_38 : i32
    scf.if %209 {
      %c0_39 = arith.constant 0 : index
      %c0_40 = arith.constant 0 : index
      %c0_41 = arith.constant 0 : index
      %210 = vector.load %arg2[%c0_39, %c0_40, %c0_41] : memref<1x8x128xf32, #tpu.memory_space<vmem>>, vector<1x8x128xf32>
      %211 = vector.shape_cast %210 : vector<1x8x128xf32> to vector<8x128xf32>
      %c0_42 = arith.constant 0 : index
      %c0_43 = arith.constant 0 : index
      %212 = vector.load %arg9[%c0_42, %c0_43] : memref<8x128xf32, #tpu.memory_space<vmem>>, vector<8x128xf32>
      %213 = vector.broadcast %5 : vector<8x1xf32> to vector<8x128xf32>
      %214 = arith.mulf %213, %212 : vector<8x128xf32>
      %215 = arith.addf %211, %214 : vector<8x128xf32>
      %c0_44 = arith.constant 0 : index
      %c0_45 = arith.constant 0 : index
      %c0_46 = arith.constant 0 : index
      %216 = vector.load %arg8[%c0_44, %c0_45, %c0_46] : memref<1x8x128xf32, #tpu.memory_space<vmem>>, vector<1x8x128xf32>
      %217 = vector.shape_cast %216 : vector<1x8x128xf32> to vector<8x128xf32>
      %218 = vector.shape_cast %215 : vector<8x128xf32> to vector<1x8x128xf32>
      tpu.vector_store %arg8[%c0_44, %c0_45, %c0_46], %218 {strides = array<i32>} : memref<1x8x128xf32, #tpu.memory_space<vmem>>, vector<1x8x128xf32>,
    } else {
    }
    return
  }
  func.func @transform_0(%arg0: i32, %arg1: i32) -> (i32, i32, i32) {
    %c0_i32 = arith.constant 0 : i32
    %c0_i32_0 = arith.constant 0 : i32
    %c0_i32_1 = arith.constant 0 : i32
    return %arg0, %c0_i32, %c0_i32_0 : i32, i32, i32
  }
  func.func @transform_1(%arg0: i32, %arg1: i32) -> (i32, i32, i32) {
    %c0_i32 = arith.constant 0 : i32
    %c0_i32_0 = arith.constant 0 : i32
    return %arg0, %c0_i32, %arg1 : i32, i32, i32
  }
  func.func @transform_2(%arg0: i32, %arg1: i32) -> (i32, i32, i32) {
    %c1_i32 = arith.constant 1 : i32
    %0 = arith.muli %arg1, %c1_i32 : i32
    %c1_i32_0 = arith.constant 1 : i32
    %1 = arith.subi %0, %c1_i32_0 : i32
    %c0_i32 = arith.constant 0 : i32
    %2 = arith.maxsi %1, %c0_i32 : i32
    %c0_i32_1 = arith.constant 0 : i32
    %c0_i32_2 = arith.constant 0 : i32
    return %arg0, %c0_i32_1, %2 : i32, i32, i32
  }
  func.func @transform_3(%arg0: i32, %arg1: i32) -> (i32, i32, i32) {
    %c1_i32 = arith.constant 1 : i32
    %0 = arith.addi %arg1, %c1_i32 : i32
    %c1_i32_0 = arith.constant 1 : i32
    %1 = arith.muli %0, %c1_i32_0 : i32
    %c3_i32 = arith.constant 3 : i32
    %2 = arith.minsi %1, %c3_i32 : i32
    %c0_i32 = arith.constant 0 : i32
    %c0_i32_1 = arith.constant 0 : i32
    return %arg0, %c0_i32, %2 : i32, i32, i32
  }
  func.func @transform_4(%arg0: i32, %arg1: i32) -> (i32, i32, i32) {
    %c0_i32 = arith.constant 0 : i32
    %c0_i32_0 = arith.constant 0 : i32
    return %arg0, %arg1, %c0_i32 : i32, i32, i32
  }
  func.func @transform_5(%arg0: i32, %arg1: i32) -> (i32, i32) {
    %c0_i32 = arith.constant 0 : i32
    %c0_i32_0 = arith.constant 0 : i32
    %c0_i32_1 = arith.constant 0 : i32
    return %c0_i32, %c0_i32_0 : i32, i32
  }
  func.func @transform_6(%arg0: i32, %arg1: i32) -> (i32, i32, i32) {
    %c0_i32 = arith.constant 0 : i32
    %c0_i32_0 = arith.constant 0 : i32
    %c0_i32_1 = arith.constant 0 : i32
    return %arg0, %c0_i32, %c0_i32_0 : i32, i32, i32
  }
}

</mosaic_0001>

<bundles_post_ra>
// kernel: tpu_custom_call.1
= control target key start
LH: loop header
LB: loop body
LE: loop exit
PB: predicated region body
PF: predicated region fallthrough
CT: control target
= control target key end

     0   :  { %s3479_s0 = inlined_call_operand.hbm [shape: f32[2,8,128], index: 0, kind: input, shape index: {}]   ;;  %s3480_s1 = inlined_call_operand.hbm [shape: bf16[2,128,1024], index: 1, kind: input, shape index: {}]   ;;  %s3481_s2 = inlined_call_operand.hbm [shape: bf16[2,128,1024], index: 2, kind: input, shape index: {}]   ;;  %s3482_s3 = inlined_call_operand.hbm [shape: bf16[2,128,1024], index: 3, kind: input, shape index: {}]   ;;  %s3483_s4 = inlined_call_operand.hbm [shape: bf16[2,1024,128], index: 4, kind: input, shape index: {}]   ;;  %s3484_s5 = inlined_call_operand.vmem [shape: f32[8,23], index: 5, kind: input, shape index: {}]   ;;  %s3485_s6 = inlined_call_operand.hbm [shape: f32[2,8,128], index: 6, kind: output, shape index: {}]  }
   0x1   :  { %3530 = sst [smem:[#allocation42_spill]] %s3479_s0 }
   0x2   :  { %3531 = sst [smem:[#allocation43_spill]] %s3480_s1 }
   0x3   :  { %3532 = sst [smem:[#allocation44_spill]] %s3481_s2 }
   0x4   :  { %3533 = sst [smem:[#allocation45_spill]] %s3482_s3 }
   0x5   :  { %3534 = sst [smem:[#allocation46_spill]] %s3483_s4 }
   0x6   :  { %3535 = sst [smem:[#allocation47_spill]] %s3484_s5 }
   0x7   :  { %3536 = sst [smem:[#allocation48_spill]] %s3485_s6 }
   0x8   :  { %11 = vsyncpa [#allocation5], 0 }
   0x9   :  { %13 = vsyncpa [#allocation5 + $0x1], 0 }
   0xa   :  { %14 = vsyncpa [#allocation8], 0 }
   0xb   :  { %16 = vsyncpa [#allocation8 + $0x1], 0 }
   0xc   :  { %17 = vsyncpa [#allocation11], 0 }
   0xd   :  { %19 = vsyncpa [#allocation11 + $0x1], 0 }
   0xe   :  { %20 = vsyncpa [#allocation6], 0 }
   0xf   :  { %22 = vsyncpa [#allocation6 + $0x1], 0  ;;  %s2567_s21 = smov 0   ;;  %s2569_s22 = smov 0  }
  0x10   :  { %s2571_s23 = smov 0   ;;  %s2573_s24 = smov 0  }
  0x11   :  { %s2575_s25 = smov 0   ;;  %s2577_s26 = smov 0  }
  0x12   :  { %s2579_s27 = smov 0   ;;  %s2581_s28 = smov 0  }
  0x13   :  { %s2583_s29 = smov 0   ;;  %s2585_s30 = smov 0  }
  0x14   :  { %s2587_s7 = smov 0   ;;  %s2589_s8 = smov 0  }
  0x15   :  { %s2591_s9 = smov 0   ;;  %s2593_s10 = smov 0  }
  0x16   :  { %s2595_s11 = smov 0   ;;  %s2597_s12 = smov 0  }
  0x17   :  { %s2599_s13 = smov 0  }
  0x18 LB: > { %3537 = sst [smem:[#allocation20_spill]] %s2427_s21  ;;  %p3493_p0 = scmp.eq.s32.totalorder %s2491_s13, 0  ;;  %s2491_s13 = sphi %s2599_s13, %s28_s13   ;;  %s2487_s12 = sphi %s2597_s12, %s3639_s12   ;;  %s2483_s11 = sphi %s2595_s11, %s3638_s11   ;;  %s2479_s10 = sphi %s2593_s10, %s3637_s10   ;;  %s2475_s9 = sphi %s2591_s9, %s3636_s9   ;;  %s2471_s8 = sphi %s2589_s8, %s3635_s8   ;;  %s2467_s7 = sphi %s2587_s7, %s3645_s7   ;;  %s2463_s30 = sphi %s2585_s30, %s3644_s30   ;;  %s2459_s29 = sphi %s2583_s29, %s3633_s29   ;;  %s2455_s28 = sphi %s2581_s28, %s3643_s28   ;;  %s2451_s27 = sphi %s2579_s27, %s3642_s27   ;;  %s2447_s26 = sphi %s2577_s26, %s3631_s26   ;;  %s2443_s25 = sphi %s2575_s25, %s3641_s25   ;;  %s2439_s24 = sphi %s2573_s24, %s3640_s24   ;;  %s2435_s23 = sphi %s2571_s23, %s3629_s23   ;;  %s2431_s22 = sphi %s2569_s22, %s3628_s22   ;;  %s2427_s21 = sphi %s2567_s21, %s3627_s21  }
  0x19   : > { %3538 = sst [smem:[#allocation21_spill]] %s2431_s22  ;;  %p82_p1 = scmp.ne.s32.totalorder %s2459_s29, %s2455_s28 }
  0x1a   : > { %3539 = sst [smem:[#allocation22_spill]] %s2435_s23  ;;  %p3492_p4 = scmp.lt.s32.totalorder %s2491_s13, 8 }
  0x1b   : > { %3540 = sst [smem:[#allocation23_spill]] %s2447_s26  ;;  %p2661_p3 = por %p82_p1, %p3493_p0 }
  0x1c   : > { %3541 = sst [smem:[#allocation24_spill]] %s2459_s29  ;;  %s2667_s17 = sshll.u32 %s2487_s12, 7 }
  0x1d   : > { %3542 = sst [smem:[#allocation25_spill]] %s2463_s30  ;;  %s3491_s18 = sand.u32 1, %s2491_s13  }
  0x1e   : > { %3543 = sst [smem:[#allocation26_spill]] %s2471_s8  ;;  %s278_s19 = sand.u32 1, %s2459_s29  }
  0x1f   : > { %3544 = sst [smem:[#allocation27_spill]] %s2475_s9  ;;  %s2671_s20 = sshll.u32 %s278_s19, 7 }
  0x20   : > { %3545 = sst [smem:[#allocation28_spill]] %s2479_s10  ;;  %s1714_s15 = sshll.u32 %s2483_s11, 1 }
  0x21   : > { %3546 = sst [smem:[#allocation29_spill]] %s2483_s11  ;;  %s286_s14 = sadd.s32 %s1714_s15, %s2667_s17 }
  0x22   : > { %3547 = sst [smem:[#allocation30_spill]] %s2487_s12  ;;  %s1716_s6 = sshll.u32 %s286_s14, 6 }
  0x23   : > { %3548 = sst [smem:[#allocation31_spill]] %s2491_s13  ;;  %s280_s10 = scalar_lea.vmem [#allocation7], %s2671_s20 }
  0x24   : > { %3550 = sst [smem:[#allocation32_spill]] %s2671_s20  ;;  %s289_s5 = sshll.u32 %s280_s10, 4  ;;  %s2681_s5 = int_to_ptr.vmem [resolvable:$true] %s289_s5 }
  0x25   : > { %s3551_s1 = sld [smem:[#allocation43_spill]]  ;;  %p2687_p5 = pnand %p3492_p4, %p2661_p3 }
  0x26   : > { %p1730_p6 = scmp.ge.s32.totalorder %s2491_s13, 1  ;;  %s2694_s10 = scalar_lea.sflag [#allocation8], %s3491_s18 }
  0x27   : > { %s3552_s19 = scalar_select %p2687_p5, 1, 0 }
  0x28   : > { %3554 = sst [smem:[#allocation34_spill]] %s2694_s10  ;;  %p3514_p8 = pneg %p2687_p5 }
  0x29   : > { %3553 = sst [smem:[#allocation33_spill]] %s3552_s19 }
  0x2b   : > { %s2679_s2 = scalar_lea.hbm %s3551_s1, %s1716_s6  ;;  %s2160_s14 = scalar_lea.hbm %s3551_s1, 16384 }
  0x2c   : > { %s2155_s4 = scalar_lea.hbm %s2679_s2, 2048  ;;  %p2161_p11 = scmp.lt.u32.totalorder %s2679_s2, %s3551_s1 }
  0x2d   : > { %p2156_p7 = scmp.ne.s32.totalorder %s2679_s2, %s2155_s4  ;;  %p2162_p12 = scmp.lt.u32.totalorder %s2160_s14, %s2155_s4 }
  0x2e   : > { %p2164_p1 = scmp.lt.u32.totalorder %s2155_s4, %s2679_s2 }
  0x2f   : > { %p2158_p9 = pnand %p3514_p8, %p2156_p7  ;;  %p2163_p13 = por %p2162_p12, %p2161_p11 }
  0x31   : > { %p2159_p10 = pneg %p2158_p9  ;;  %p2165_p3 = por %p2164_p1, %p2163_p13 }
  0x33   : > { %p2166_p2 = pnand %p2165_p3, %p2159_p10 }
  0x35   : > { %2169 = shalt.err (!%p2166_p2)
}
  0x36   : > { %s2170_s18 = scalar_lea.vmem %s2681_s5, 2048  ;;  %s2493_s6 = smov [#allocation7]  }
  0x37   : > { %p2171_p7 = scmp.ne.s32.totalorder %s2681_s5, %s2170_s18  ;;  %s2175_s9 = sshll.u32 %s2493_s6, 4  ;;  %s2176_s9 = int_to_ptr.vmem [resolvable:$false] %s2175_s9 }
  0x38   : > { %s2177_s15 = scalar_lea.vmem %s2176_s9, 4096  ;;  %p2178_p0 = scmp.lt.s32.totalorder %s2681_s5, %s2176_s9 }
  0x39   : > { %p2173_p9 = pnand %p2171_p7, %p3514_p8  ;;  %p2179_p11 = scmp.lt.s32.totalorder %s2177_s15, %s2170_s18 }
  0x3b   : > { %p2174_p4 = pneg %p2173_p9  ;;  %p2180_p12 = por %p2179_p11, %p2178_p0 }
  0x3d   : > { %p2181_p13 = pnand %p2180_p12, %p2174_p4 }
  0x3f   : > { %2184 = shalt.err (!%p2181_p13)
}
  0x40   : > { %s3494_s4 = smov 512   ;;  %s3496_s18 = smov 128  }
  0x41   : > { %s3498_s14 = smov 8   ;;  %p372_p0 = scmp.lt.s32.totalorder %s2491_s13, 9 }
  0x42   : > { %1859 = dma.hbm_to_vmem [thread:$0]  (!%p2687_p5), %s2679_s2, 2048, %s2681_s5, %s2694_s10, %s3494_s4, %s3496_s18, %s3498_s14  }
  0x43   : > { %p2728_p2 = pnand %p1730_p6, %p372_p0  ;;  %s37_s6 = sadd.s32 1, %s2483_s11 }
  0x44   : > { %s143_s9 = sadd.s32 1, %s2435_s23  ;;  %p38_p4 = scmp.ge.s32.totalorder %s37_s6, 4 }
  0x45   : > { %s3555_s16 = scalar_select %p2728_p2, 1, 0 }
  0x46   : > { %p133_p10 = scmp.lt.s32.totalorder %s37_s6, 3  ;;  %p150_p1 = scmp.ne.s32.totalorder %s2435_s23, %s2431_s22 }
  0x47   : > { %3556 = sst [smem:[#allocation35_spill]] %s3555_s16  ;;  %s3558_s1 = sadd.s32 1, %s2487_s12 }
  0x48   : > { %s2738_s15 = scalar_select %p38_p4, 0, %s37_s6  }
  0x49   : > { %s3647_s1 = smov (!%p38_p4, %s3558_s1), %s2487_s12  ;;  %s3649_s6 = smov (!%p133_p10, %s37_s6), 3 }
  0x4a   : > { %3557 = sst [smem:[#allocation36_spill]] %s2738_s15  ;;  %s71_s2 = ssub.s32 %s2483_s11, %s2738_s15 }
  0x4b   : > { %s135_s5 = sadd.s32 1, %s2738_s15  ;;  %p42_p6 = scmp.ge.s32.totalorder %s3647_s1, 2 }
  0x4c   : > { %p136_p7 = scmp.lt.s32.totalorder %s135_s5, 3  ;;  %p3560_p9 = scmp.eq.s32.totalorder %s2491_s13, 0 }
  0x4d   : > { %s3651_s1 = smov (%p42_p6, %s3647_s1), 0  ;;  %s3562_s20 = sadd.s32 1, %s2459_s29 }
  0x4e   : > { %3559 = sst [smem:[#allocation37_spill]] %s3651_s1  ;;  %s3653_s5 = smov (!%p136_p7, %s135_s5), 3 }
  0x4f   : > { %s2750_s4 = ssub.s32 %s2487_s12, %s3651_s1  ;;  %p2754_p11 = por %p150_p1, %p3560_p9 }
  0x50   : > { %s72_s14 = sor.u32 %s71_s2, %s2750_s4  ;;  %s139_s16 = ssub.s32 %s3649_s6, %s3653_s5 }
  0x51   : > { %p73_p12 = scmp.eq.s32.totalorder %s72_s14, 0  ;;  %s140_s19 = sor.u32 %s139_s16, %s2750_s4 }
  0x52   : > { %p141_p13 = scmp.eq.s32.totalorder %s140_s19, 0  ;;  %s327_s12 = sand.u32 1, %s2435_s23  }
  0x53   : > { %s2763_s10 = scalar_select %p73_p12, %s2459_s29, %s3562_s20  }
  0x54   : > { %s2766_s1 = scalar_select %p141_p13, %s2435_s23, %s143_s9  }
  0x55   : > { %3563 = sst [smem:[#allocation38_spill]] %s2763_s10  ;;  %s1723_s26 = sshll.u32 %s3649_s6, 1 }
  0x56   : > { %3564 = sst [smem:[#allocation39_spill]] %s2766_s1  ;;  %s1722_s15 = sshll.u32 %s327_s12, 7 }
  0x57   : > { %s338_s11 = sadd.s32 %s1723_s26, %s2667_s17  ;;  %s3565_s3 = sld [smem:[#allocation45_spill]] }
  0x58   : > { %s1725_s0 = sshll.u32 %s338_s11, 6  ;;  %s329_s19 = scalar_lea.vmem [#allocation10], %s1722_s15 }
  0x59   : > { %s341_s14 = sshll.u32 %s329_s19, 4  ;;  %p3566_p0 = scmp.lt.s32.totalorder %s2491_s13, 8  ;;  %s2775_s14 = int_to_ptr.vmem [resolvable:$true] %s341_s14 }
  0x5a   : > { %s3568_s26 = sand.u32 1, %s2491_s13  }
  0x5b   : > { %p2781_p4 = pnand %p3566_p0, %p2754_p11  ;;  %s2787_s21 = scalar_lea.sflag [#allocation11], %s3568_s26 }
  0x5d   : > { %s2773_s2 = scalar_lea.hbm %s3565_s3, %s1725_s0  ;;  %p2187_p1 = pneg %p2781_p4 }
  0x5e   : > { %s2185_s0 = scalar_lea.hbm %s2773_s2, 2048  ;;  %s2190_s12 = scalar_lea.hbm %s3565_s3, 16384 }
  0x5f   : > { %p2186_p10 = scmp.ne.s32.totalorder %s2773_s2, %s2185_s0  ;;  %p2191_p9 = scmp.lt.u32.totalorder %s2773_s2, %s3565_s3 }
  0x60   : > { %p2192_p11 = scmp.lt.u32.totalorder %s2190_s12, %s2185_s0  ;;  %p2194_p13 = scmp.lt.u32.totalorder %s2185_s0, %s2773_s2 }
  0x61   : > { %p2188_p6 = pnand %p2187_p1, %p2186_p10 }
  0x62   : > { %p2193_p12 = por %p2192_p11, %p2191_p9 }
  0x63   : > { %p2189_p7 = pneg %p2188_p6 }
  0x64   : > { %p2195_p0 = por %p2194_p13, %p2193_p12 }
  0x66   : > { %p2196_p8 = pnand %p2195_p0, %p2189_p7 }
  0x68   : > { %2199 = shalt.err (!%p2196_p8)
}
  0x69   : > { %s2200_s6 = scalar_lea.vmem %s2775_s14, 2048  ;;  %s2497_s9 = smov [#allocation10]  }
  0x6a   : > { %p2201_p10 = scmp.ne.s32.totalorder %s2775_s14, %s2200_s6  ;;  %s2205_s15 = sshll.u32 %s2497_s9, 4  ;;  %s2206_s15 = int_to_ptr.vmem [resolvable:$false] %s2205_s15 }
  0x6b   : > { %s2207_s5 = scalar_lea.vmem %s2206_s15, 4096  ;;  %p2208_p2 = scmp.lt.s32.totalorder %s2775_s14, %s2206_s15 }
  0x6c   : > { %p2203_p6 = pnand %p2201_p10, %p2187_p1  ;;  %p2209_p9 = scmp.lt.s32.totalorder %s2207_s5, %s2200_s6 }
  0x6e   : > { %p2204_p3 = pneg %p2203_p6  ;;  %p2210_p11 = por %p2209_p9, %p2208_p2 }
  0x70   : > { %p2211_p12 = pnand %p2210_p11, %p2204_p3 }
  0x72   : > { %2214 = shalt.err (!%p2211_p12)
}
  0x73   : > { %s3569_s19 = smov 8   ;;  %s3570_s26 = smov 128  }
  0x74   : > { %s3571_s0 = smov 512   ;;  %s3572_s20 = sld [smem:[#allocation21_spill]] }
  0x75   : > { %1865 = dma.hbm_to_vmem [thread:$0]  (!%p2781_p4), %s2773_s2, 2048, %s2775_s14, %s2787_s21, %s3571_s0, %s3570_s26, %s3569_s19  }
  0x76   : > { %s3573_s22 = sld [smem:[#allocation20_spill]]  ;;  %s2819_s11 = sadd.s32 4294967295, %s2491_s13  }
  0x77   : > { %s1706_s12 = sadd.s32 4294967294, %s2491_s13   ;;  %p45_p8 = scmp.eq.s32.totalorder %s2750_s4, 0 }
  0x78   : > { %s47_s18 = sadd.s32 1, %s2471_s8  ;;  %p54_p2 = scmp.ne.s32.totalorder %s2471_s8, %s2467_s7 }
  0x79   : > { %s2827_s16 = scalar_select %p45_p8, %s2471_s8, %s47_s18  }
  0x7a   : > { %p3575_p3 = scmp.eq.s32.totalorder %s2491_s13, 0  ;;  %p60_p4 = scmp.ne.s32.totalorder %s2467_s7, %s2463_s30 }
  0x7b   : > { %3574 = sst [smem:[#allocation40_spill]] %s2827_s16  ;;  %p61_p7 = scmp.eq.s32.totalorder %s2819_s11, 0 }
  0x7c   : > { %p2831_p1 = por %p3575_p3, %p54_p2  ;;  %p122_p13 = scmp.ne.s32.totalorder %s2443_s25, %s2439_s24 }
  0x7d   : > { %p229_p0 = scmp.eq.s32.totalorder %s2819_s11, 7  ;;  %p235_p10 = scmp.eq.s32.totalorder %s1706_s12, 7 }
  0x7e   : > { %s3576_s6 = scalar_select %p2831_p1, 1, 0 }
  0x7f   : > { %p2841_p6 = por %p61_p7, %p60_p4  ;;  %p3578_p9 = scmp.ne.s32.totalorder %s2455_s28, %s2451_s27 }
  0x80   : > { %p2852_p12 = por %p122_p13, %p61_p7  ;;  %p3581_p8 = scmp.ne.s32.totalorder %s3572_s20, %s3573_s22 }
  0x81   : > { %p2848_p11 = por %p3578_p9, %p61_p7  ;;  %p2863_p5 = por %p229_p0, %p54_p2 }
  0x82   : > { %s3580_s9 = scalar_select %p2852_p12, 1, 0 }
  0x83   : > { %s3579_s14 = scalar_select %p2848_p11, 1, 0 }
  0x84   : > { %p2859_p3 = por %p3581_p8, %p61_p7  ;;  %p2867_p1 = por %p235_p10, %p60_p4 }
  0x85   : > { %s3583_s24 = scalar_select %p2863_p5, 1, 0 }
  0x86   : > { %s3582_s15 = scalar_select %p2859_p3, 1, 0 }
  0x87   : > { %s3584_s5 = scalar_select %p2867_p1, 1, 0 }
  0x88   : > { %s258_s27 = sand.u32 1, %s2471_s8   ;;  %s3586_s3 = sld [smem:[#allocation42_spill]] }
  0x89   : > { %3585 = sst [smem:[#allocation20_spill]] %s3584_s5  ;;  %s1711_s20 = sshll.u32 %s258_s27, 3 }
  0x8a   : > { %p3587_p7 = scmp.ne.s32.totalorder %s3576_s6, 0  ;;  %p3588_p2 = scmp.lt.s32.totalorder %s2491_s13, 8 }
  0x8b   : > { %s262_s10 = scalar_lea.vmem [#allocation4], %s1711_s20  ;;  %s259_s12 = scalar_lea.sflag [#allocation5], %s258_s27 }
  0x8c   : > { %p2882_p13 = pnand %p3588_p2, %p3587_p7  ;;  %s269_s8 = sshll.u32 %s262_s10, 4  ;;  %s2886_s8 = int_to_ptr.vmem [resolvable:$true] %s269_s8 }
  0x8e   : > { %s2876_s16 = scalar_lea.hbm %s3586_s3, %s2667_s17  ;;  %p2217_p0 = pneg %p2882_p13 }
  0x8f   : > { %s2215_s18 = scalar_lea.hbm %s2876_s16, 128  ;;  %s2220_s1 = scalar_lea.hbm %s3586_s3, 256 }
  0x90   : > { %p2216_p4 = scmp.ne.s32.totalorder %s2876_s16, %s2215_s18  ;;  %p2221_p8 = scmp.lt.u32.totalorder %s2876_s16, %s3586_s3 }
  0x91   : > { %p2222_p7 = scmp.lt.u32.totalorder %s2220_s1, %s2215_s18  ;;  %p2224_p1 = scmp.lt.u32.totalorder %s2215_s18, %s2876_s16 }
  0x92   : > { %p2218_p10 = pnand %p2217_p0, %p2216_p4 }
  0x93   : > { %p2223_p2 = por %p2222_p7, %p2221_p8 }
  0x94   : > { %p2219_p9 = pneg %p2218_p10 }
  0x95   : > { %p2225_p5 = por %p2224_p1, %p2223_p2 }
  0x97   : > { %p2226_p3 = pnand %p2225_p5, %p2219_p9 }
  0x99   : > { %2229 = shalt.err (!%p2226_p3)
}
  0x9a   : > { %s2230_s10 = scalar_lea.vmem %s2886_s8, 128  ;;  %s2498_s29 = smov [#allocation4]  }
  0x9b   : > { %p2231_p4 = scmp.ne.s32.totalorder %s2886_s8, %s2230_s10  ;;  %s2235_s27 = sshll.u32 %s2498_s29, 4  ;;  %s2236_s27 = int_to_ptr.vmem [resolvable:$false] %s2235_s27 }
  0x9c   : > { %s2237_s23 = scalar_lea.vmem %s2236_s27, 256  ;;  %p2238_p11 = scmp.lt.s32.totalorder %s2886_s8, %s2236_s27 }
  0x9d   : > { %p2233_p10 = pnand %p2231_p4, %p2217_p0  ;;  %p2239_p8 = scmp.lt.s32.totalorder %s2237_s23, %s2230_s10 }
  0x9f   : > { %p2234_p12 = pneg %p2233_p10  ;;  %p2240_p7 = por %p2239_p8, %p2238_p11 }
  0xa1   : > { %p2241_p1 = pnand %p2240_p7, %p2234_p12 }
  0xa3   : > { %2244 = shalt.err (!%p2241_p1)
}
  0xa4   : > { %s3590_s1 = sld [smem:[#allocation29_spill]]  ;;  %s3591_s5 = sld [smem:[#allocation36_spill]] }
  0xa5   : > { %s3592_s20 = sld [smem:[#allocation23_spill]]  ;;  %p3593_p3 = scmp.eq.s32.totalorder %s2491_s13, 0 }
  0xa6   : > { %1856 = dma.hbm_to_vmem [thread:$0]  (!%p2882_p13), %s2876_s16, 128, %s2886_s8, %s259_s12  }
  0xa7   : > { %p3595_p13 = scmp.lt.s32.totalorder %s2491_s13, 8 }
  0xaa   : > { %s1707_s18 = sadd.s32 4294967295, %s3590_s1  ;;  %s1708_s6 = sadd.s32 4294967295, %s3591_s5 }
  0xab   : > { %p99_p5 = scmp.gt.s32.totalorder %s1707_s18, 0  ;;  %p102_p11 = scmp.gt.s32.totalorder %s1708_s6, 0 }
  0xac   : > { %s109_s10 = sadd.s32 1, %s3592_s20  ;;  %p116_p12 = scmp.ne.s32.totalorder %s3592_s20, %s2443_s25 }
  0xad   : > { %s3655_s18 = smov (!%p99_p5, %s1707_s18), 0  ;;  %s3657_s6 = smov (!%p102_p11, %s1708_s6), 0 }
  0xae   : > { %s301_s22 = sand.u32 1, %s3592_s20   ;;  %s105_s29 = ssub.s32 %s3655_s18, %s3657_s6 }
  0xaf   : > { %s1717_s27 = sshll.u32 %s301_s22, 7  ;;  %s106_s23 = sor.u32 %s105_s29, %s2750_s4 }
  0xb0   : > { %p118_p0 = por %p116_p12, %p3593_p3  ;;  %p107_p9 = scmp.eq.s32.totalorder %s106_s23, 0 }
  0xb1   : > { %s1719_s8 = sshll.u32 %s3655_s18, 1  ;;  %s303_s16 = scalar_lea.vmem [#allocation9], %s1717_s27 }
  0xb2   : > { %s315_s12 = sshll.u32 %s303_s16, 4  ;;  %s3659_s20 = smov (!%p107_p9, %s3592_s20), %s109_s10  ;;  %s2926_s12 = int_to_ptr.vmem [resolvable:$true] %s315_s12 }
  0xb3   : > { %3594 = sst [smem:[#allocation41_spill]] %s3659_s20  ;;  %s312_s5 = sadd.s32 %s1719_s8, %s2667_s17 }
  0xb4   : > { %s1721_s3 = sshll.u32 %s312_s5, 6  ;;  %p2930_p2 = pnand %p3595_p13, %p118_p0 }
  0xb5   : > { %s3597_s4 = sld [smem:[#allocation44_spill]]  ;;  %s1727_s18 = sshll.u32 %s3590_s1, 5 }
  0xb6   : > { %p2247_p10 = pneg %p2930_p2 }
  0xbb   : > { %s2937_s29 = scalar_lea.hbm %s3597_s4, %s1721_s3  ;;  %s2250_s8 = scalar_lea.hbm %s3597_s4, 16384 }
  0xbc   : > { %s2245_s10 = scalar_lea.hbm %s2937_s29, 2048  ;;  %p2251_p1 = scmp.lt.u32.totalorder %s2937_s29, %s3597_s4 }
  0xbd   : > { %p2246_p4 = scmp.ne.s32.totalorder %s2937_s29, %s2245_s10  ;;  %p2252_p5 = scmp.lt.u32.totalorder %s2250_s8, %s2245_s10 }
  0xbe   : > { %p2254_p12 = scmp.lt.u32.totalorder %s2245_s10, %s2937_s29 }
  0xbf   : > { %p2248_p8 = pnand %p2247_p10, %p2246_p4  ;;  %p2253_p11 = por %p2252_p5, %p2251_p1 }
  0xc1   : > { %p2249_p7 = pneg %p2248_p8  ;;  %p2255_p3 = por %p2254_p12, %p2253_p11 }
  0xc3   : > { %p2256_p0 = pnand %p2255_p3, %p2249_p7 }
  0xc5   : > { %2259 = shalt.err (!%p2256_p0)
}
  0xc6   : > { %s2260_s5 = scalar_lea.vmem %s2926_s12, 2048  ;;  %s2499_s6 = smov [#allocation9]  }
  0xc7   : > { %p2261_p9 = scmp.ne.s32.totalorder %s2926_s12, %s2260_s5  ;;  %s2265_s22 = sshll.u32 %s2499_s6, 4  ;;  %s2266_s22 = int_to_ptr.vmem [resolvable:$false] %s2265_s22 }
  0xc8   : > { %s2267_s27 = scalar_lea.vmem %s2266_s22, 4096  ;;  %p2268_p8 = scmp.lt.s32.totalorder %s2926_s12, %s2266_s22 }
  0xc9   : > { %p2263_p13 = pnand %p2261_p9, %p2247_p10  ;;  %p2269_p1 = scmp.lt.s32.totalorder %s2267_s27, %s2260_s5 }
  0xcb   : > { %p2264_p4 = pneg %p2263_p13  ;;  %p2270_p5 = por %p2269_p1, %p2268_p8 }
  0xcd   : > { %p2271_p11 = pnand %p2270_p5, %p2264_p4 }
  0xcf   : > { %2274 = shalt.err (!%p2271_p11)
}
  0xd0   : > { %s3598_s10 = sld [smem:[#allocation34_spill]]  ;;  %s3599_s23 = sld [smem:[#allocation32_spill]] }
  0xd1   : > { %s3600_s8 = sld [smem:[#allocation33_spill]]  ;;  %s361_s16 = sadd.s32 %s1727_s18, %s2667_s17 }
  0xd2   : > { %s1729_s6 = sshll.u32 %s361_s16, 6  ;;  %s3601_s27 = sld [smem:[#allocation46_spill]] }
  0xd6   : > { %1862 = dma.hbm_to_vmem [thread:$0]  (!%p2930_p2), %s2937_s29, 2048, %s2926_s12, %s3598_s10, %s3571_s0, %s3570_s26, %s3569_s19  }
  0xd7   : > { %s355_s3 = scalar_lea.vmem [#allocation12], %s3599_s23  ;;  %p3603_p7 = scmp.ne.s32.totalorder %s3600_s8, 0 }
  0xd8   : > { %s364_s5 = sshll.u32 %s355_s3, 4  ;;  %s3602_s4 = smov %s3601_s27  ;;  %s2973_s5 = int_to_ptr.vmem [resolvable:$true] %s364_s5 }
  0xd9   : > { %s2978_s20 = scalar_lea.hbm %s3601_s27, %s1729_s6  ;;  %p3604_p2 = pneg %p3603_p7 }
  0xda   : > { %s2275_s13 = scalar_lea.hbm %s2978_s20, 2048  ;;  %s2280_s26 = scalar_lea.hbm %s3602_s4, 16384 }
  0xdb   : > { %p2276_p10 = scmp.ne.s32.totalorder %s2978_s20, %s2275_s13  ;;  %p2281_p0 = scmp.lt.u32.totalorder %s2978_s20, %s3602_s4 }
  0xdc   : > { %p2282_p9 = scmp.lt.u32.totalorder %s2280_s26, %s2275_s13  ;;  %p2284_p4 = scmp.lt.u32.totalorder %s2275_s13, %s2978_s20 }
  0xdd   : > { %p2278_p12 = pnand %p2276_p10, %p3604_p2 }
  0xde   : > { %p2283_p13 = por %p2282_p9, %p2281_p0 }
  0xdf   : > { %p2279_p3 = pneg %p2278_p12 }
  0xe0   : > { %p2285_p8 = por %p2284_p4, %p2283_p13 }
  0xe2   : > { %p2286_p1 = pnand %p2285_p8, %p2279_p3 }
  0xe4   : > { %2289 = shalt.err (!%p2286_p1)
}
  0xe5   : > { %s2290_s12 = scalar_lea.vmem %s2973_s5, 2048  ;;  %p3605_p11 = pmov %p3604_p2 }
  0xe6   : > { %p2291_p5 = scmp.ne.s32.totalorder %s2973_s5, %s2290_s12  ;;  %s2500_s29 = smov [#allocation12]  }
  0xe7   : > { %s2295_s18 = sshll.u32 %s2500_s29, 4  ;;  %s2296_s18 = int_to_ptr.vmem [resolvable:$false] %s2295_s18 }
  0xe8   : > { %p2293_p10 = pnand %p2291_p5, %p3605_p11  ;;  %s2297_s10 = scalar_lea.vmem %s2296_s18, 4096 }
  0xe9   : > { %p2298_p12 = scmp.lt.s32.totalorder %s2973_s5, %s2296_s18  ;;  %p2299_p0 = scmp.lt.s32.totalorder %s2297_s10, %s2290_s12 }
  0xea   : > { %p2294_p2 = pneg %p2293_p10 }
  0xeb   : > { %p2300_p9 = por %p2299_p0, %p2298_p12 }
  0xed   : > { %p2301_p13 = pnand %p2300_p9, %p2294_p2 }
  0xef   : > { %2304 = shalt.err (!%p2301_p13)
}
  0xf0   : > { %s2501_s13 = smov 64   ;;  %s2502_s23 = smov 4  }
  0xf1   : > { %1868 = dma.hbm_to_vmem [thread:$0]  (!%p3603_p7), %s2978_s20, 2048, %s2973_s5, %s2787_s21, %s2501_s13, %s2501_s13, %s2502_s23  }
  0xf2   : > { %s3606_s16 = sld [smem:[#allocation35_spill]] }
  0xf8   : > { %p3607_p3 = scmp.ne.s32.totalorder %s3606_s16, 0 }
  0xf9   : > { %s3007_s3 = sand.u32 (!%p3607_p3), 1, %s2467_s7  }
  0xfa   : > { %376 = sbr.rel (%p3607_p3) target bundleno = 1267 (0x4f3), region = 44  ;;  %s1731_s6 = sshll.u32 (!%p3607_p3), %s3007_s3, 3 }
  0xfb   : > { %s379_s22 = scalar_lea.sflag (!%p3607_p3), [#allocation5], %s3007_s3  ;;  %s3011_s30 = scalar_lea.vmem (!%p3607_p3), [#allocation4], %s1731_s6 }
 0x101   : > { %2402 = dma.done.wait (%p2841_p6), %s379_s22, 128  }
 0x102   : > { %2404 = vsyncadd (%p2841_p6), %s379_s22, 4294967168  ;;  %s387_s21 = sand.u32 1, %s2819_s11   ;;  %s389_s20 = sand.u32 1, %s2455_s28  }
 0x103   : > { %s1732_s8 = sshll.u32 %s389_s20, 7  ;;  %s388_s5 = scalar_lea.sflag [#allocation8], %s387_s21 }
 0x104   : > { %s3019_s27 = scalar_lea.vmem [#allocation7], %s1732_s8  ;;  %p3608_p7 = scmp.ne.s32.totalorder %s3579_s14, 0 }
 0x106   : > { %2406 = dma.done.wait (%p3608_p7), %s388_s5, 2048  }
 0x107   : > { %2408 = vsyncadd (%p3608_p7), %s388_s5, 4294965248  ;;  %s398_s17 = sand.u32 1, %s2443_s25   ;;  %p3609_p6 = scmp.ne.s32.totalorder %s3580_s9, 0 }
 0x108   : > { %s1733_s19 = sshll.u32 %s398_s17, 7 }
 0x109   : > { %s3026_s2 = scalar_lea.vmem [#allocation9], %s1733_s19 }
 0x10a   : > { %2410 = dma.done.wait (%p3609_p6), %s388_s5, 2048  }
 0x10b   : > { %2412 = vsyncadd (%p3609_p6), %s388_s5, 4294965248  ;;  %s3610_s11 = sld [smem:[#allocation21_spill]]  ;;  %s406_s1 = scalar_lea.sflag [#allocation11], %s387_s21 }
 0x10c   : > { %p3611_p4 = scmp.ne.s32.totalorder %s3582_s15, 0 }
 0x111   : > { %s407_s26 = sand.u32 1, %s3610_s11  }
 0x112   : > { %s1734_s0 = sshll.u32 %s407_s26, 7 }
 0x113   : > { %s3033_s12 = scalar_lea.vmem [#allocation10], %s1734_s0 }
 0x114   : > { %2414 = dma.done.wait (%p3611_p4), %s406_s1, 2048  }
 0x115   : > { %2416 = vsyncadd (%p3611_p4), %s406_s1, 4294965248  ;;  %s3039_s29 = scalar_lea.vmem [#allocation12], %s1732_s8 }
 0x116   : > { %2418 = dma.done.wait (%p3608_p7), %s406_s1, 2048  }
 0x117   : > { %2420 = vsyncadd (%p3608_p7), %s406_s1, 4294965248  ;;  %s3612_s9 = sld [smem:[#allocation27_spill]]  ;;  %s3613_s13 = sld [smem:[#allocation47_spill]] }
 0x118   : > { %s3051_s23 = scalar_lea.vmem [#allocation13], %s1731_s6 }
 0x11d   : > { %p479_p8 = scmp.eq.s32.totalorder %s3612_s9, 0  ;;  %v3049_v0 = vld [vmem:[%s3613_s13] sm:$0xff]  ;;  %p1737_p1 = scmp.ne.s32.totalorder %s3612_s9, 0 }
 0x11e   : > { %v2503_v1 = vmov (!%p1737_p1), 0   ;;  %v2504_v2 = vmov (!%p1737_p1), 1   ;;  %v2505_v3 = vmov (!%p1737_p1), 0.0   ;;  %v484_v5 = vld [vmem:[%s3011_s30] sm:$0xff] (!%p1737_p1) }
 0x11f   : > { %482 = sbr.rel (%p1737_p1) target bundleno = 426 (0x1aa), region = 68  ;;  %2044 = vset.pattern.permute.xlu0 (!%p1737_p1), %v2503_v1  ;;  %483 = vst [vmem:[#allocation2] sm:$0xff] (!%p1737_p1), %v2505_v3 }
 0x120   : > { %487 = vperm.xlu0 (!%p1737_p1), %2044, %v3049_v0  }
 0x124   : > { %2045 = vset.pattern.permute.xlu0 (!%p1737_p1), %v2504_v2 }
 0x125   : > { %492 = vperm.xlu0 (!%p1737_p1), %2045, %v3049_v0  }
 0x19f   : > { %v488_v4 = vpop.permute.xlu0 %487 }
 0x1a0   : > { %v490_v6 = vmul.f32 %v488_v4, %v484_v5 }
 0x1a4   : > { %v493_v7 = vpop.permute.xlu0 %492 }
 0x1a5   : > { %v495_v8 = vadd.f32 %v493_v7, %v490_v6 }
 0x1a7   : > { %v496_v9 = vpack.c.bf16 %v495_v8, %v495_v8 }
 0x1a9   : > { %497 = vst [vmem:[#allocation3] sm:$0xf] %v496_v9 }
 0x1aa PF: > { %v2066_v10 = vld [vmem:[%s3019_s27 + $0x4] ss:$8 sps:$4 sm:$0xff]   ;;  %v2068_v11 = vld [vmem:[%s3019_s27] ss:$8 sps:$4 sm:$0xff]   ;;  %v2506_v12 = vmov 0   ;;  %v2507_v15 = vmov 5  }
 0x1ab   : > { %627 = vmatprep.mubr.bf16.mxu0 %v2506_v12  ;;  %764 = vmatprep.mubr.bf16.mxu1 %v2506_v12  ;;  %v2069_v13 = vld [vmem:[%s3026_s2 + $0x4] ss:$8 sps:$4 sm:$0xff]   ;;  %v2071_v14 = vld [vmem:[%s3026_s2] ss:$8 sps:$4 sm:$0xff]   ;;  %v2072_v16 = vld [vmem:[%s3019_s27 + $0x14] ss:$8 sps:$4 sm:$0xff]  }
 0x1ac   : > { %595 = vmatprep.subr.bf16.mxu0 %v2066_v10  ;;  %2046 = vset.pattern.permute.xlu0 %v2507_v15  ;;  %v2074_v17 = vld [vmem:[%s3019_s27 + $0x10] ss:$8 sps:$4 sm:$0xff]   ;;  %v2075_v18 = vld [vmem:[%s3026_s2 + $0x14] ss:$8 sps:$4 sm:$0xff]   ;;  %v2508_v19 = vmov 7   ;;  %v2509_v24 = vmov 6  }
 0x1ad   : > { %596 = vmatpush1.bf16.msra.mxu0 %v2068_v11  ;;  %1041 = vperm.xlu0 %2046, %v3049_v0   ;;  %v2077_v20 = vld [vmem:[%s3026_s2 + $0x10] ss:$8 sps:$4 sm:$0xff]   ;;  %v2078_v21 = vld [vmem:[%s3019_s27 + $0x24] ss:$8 sps:$4 sm:$0xff]   ;;  %v2080_v22 = vld [vmem:[%s3019_s27 + $0x20] ss:$8 sps:$4 sm:$0xff]  }
 0x1ae   : > { %732 = vmatprep.subr.bf16.mxu1 %v2069_v13  ;;  %2048 = vset.pattern.permute.xlu1 %v2508_v19  ;;  %v2081_v23 = vld [vmem:[%s3026_s2 + $0x24] ss:$8 sps:$4 sm:$0xff]   ;;  %v2084_v25 = vld [vmem:[%s3019_s27 + $0x34] ss:$8 sps:$4 sm:$0xff]   ;;  %v2083_v26 = vld [vmem:[%s3026_s2 + $0x20] ss:$8 sps:$4 sm:$0xff]  }
 0x1af   : > { %733 = vmatpush1.bf16.msra.mxu1 %v2071_v14  ;;  %597 = vmatprep.subr.bf16.mxu0 %v2072_v16  ;;  %v2087_v27 = vld [vmem:[%s3026_s2 + $0x34] ss:$8 sps:$4 sm:$0xff]   ;;  %v2510_v28 = vmov 10   ;;  %v2086_v29 = vld [vmem:[%s3019_s27 + $0x30] ss:$8 sps:$4 sm:$0xff]   ;;  %v2511_v31 = vmov 8  }
 0x1b0   : > { %734 = vmatprep.subr.bf16.mxu1 %v2075_v18  ;;  %1061 = vperm.xlu1 %2048, %v3049_v0   ;;  %v2090_v30 = vld [vmem:[%s3019_s27 + $0x44] ss:$8 sps:$4 sm:$0xff]   ;;  %v2089_v32 = vld [vmem:[%s3026_s2 + $0x30] ss:$8 sps:$4 sm:$0xff]   ;;  %v2092_v34 = vld [vmem:[%s3019_s27 + $0x40] ss:$8 sps:$4 sm:$0xff]  }
 0x1b1   : > { %598 = vmatpush1.bf16.msra.mxu0 %v2074_v17  ;;  %2047 = vset.pattern.permute.xlu0 %v2509_v24  ;;  %v2093_v33 = vld [vmem:[%s3026_s2 + $0x44] ss:$8 sps:$4 sm:$0xff]   ;;  %v2096_v35 = vld [vmem:[%s3019_s27 + $0x54] ss:$8 sps:$4 sm:$0xff]   ;;  %v2095_v36 = vld [vmem:[%s3026_s2 + $0x40] ss:$8 sps:$4 sm:$0xff]  }
 0x1b2   : > { %599 = vmatprep.subr.bf16.mxu0 %v2078_v21  ;;  %1049 = vperm.xlu0 %2047, %v3049_v0   ;;  %v2512_v37 = vmov 9   ;;  %v2099_v38 = vld [vmem:[%s3026_s2 + $0x54] ss:$8 sps:$4 sm:$0xff]   ;;  %v2098_v39 = vld [vmem:[%s3019_s27 + $0x50] ss:$8 sps:$4 sm:$0xff]   ;;  %s3614_s14 = sld [smem:[#allocation27_spill]] }
 0x1b3   : > { %735 = vmatpush1.bf16.msra.mxu1 %v2077_v20  ;;  %v2102_v40 = vld [vmem:[%s3019_s27 + $0x64] ss:$8 sps:$4 sm:$0xff]   ;;  %v2101_v41 = vld [vmem:[%s3026_s2 + $0x50] ss:$8 sps:$4 sm:$0xff]   ;;  %v2104_v43 = vld [vmem:[%s3019_s27 + $0x60] ss:$8 sps:$4 sm:$0xff]  }
 0x1b4   : > { %736 = vmatprep.subr.bf16.mxu1 %v2081_v23  ;;  %2051 = vset.pattern.permute.xlu1 %v2510_v28  ;;  %v2105_v42 = vld [vmem:[%s3026_s2 + $0x64] ss:$8 sps:$4 sm:$0xff]   ;;  %v2108_v44 = vld [vmem:[%s3019_s27 + $0x74] ss:$8 sps:$4 sm:$0xff]   ;;  %v2107_v45 = vld [vmem:[%s3026_s2 + $0x60] ss:$8 sps:$4 sm:$0xff]  }
 0x1b5   : > { %600 = vmatpush1.bf16.msra.mxu0 %v2080_v22  ;;  %1097 = vperm.xlu1 %2051, %v3049_v0   ;;  %v2111_v46 = vld [vmem:[%s3026_s2 + $0x74] ss:$8 sps:$4 sm:$0xff]   ;;  %v2110_v47 = vld [vmem:[%s3019_s27 + $0x70] ss:$8 sps:$4 sm:$0xff]   ;;  %v2116_v48 = vld [vmem:[%s3033_s12 + $0x4] ss:$8 sps:$4 sm:$0xff]  }
 0x1b6   : > { %601 = vmatprep.subr.bf16.mxu0 %v2084_v25  ;;  %2049 = vset.pattern.permute.xlu0 %v2511_v31  ;;  %v2113_v49 = vld [vmem:[%s3026_s2 + $0x70] ss:$8 sps:$4 sm:$0xff]   ;;  %v498_v50 = vld [vmem:[#allocation3] sm:$0xf]  ;;  %v2114_v51 = vld [vmem:[%s3033_s12] ss:$8 sps:$4 sm:$0xff]  }
 0x1b7   : > { %737 = vmatpush1.bf16.msra.mxu1 %v2083_v26  ;;  %1073 = vperm.xlu0 %2049, %v3049_v0   ;;  %v2119_v52 = vld [vmem:[%s3033_s12 + $0x14] ss:$8 sps:$4 sm:$0xff]   ;;  %v2117_v53 = vld [vmem:[%s3033_s12 + $0x10] ss:$8 sps:$4 sm:$0xff]   ;;  %v2122_v54 = vld [vmem:[%s3033_s12 + $0x24] ss:$8 sps:$4 sm:$0xff]  }
 0x1b8   : > { %738 = vmatprep.subr.bf16.mxu1 %v2087_v27  ;;  %v2120_v55 = vld [vmem:[%s3033_s12 + $0x20] ss:$8 sps:$4 sm:$0xff]   ;;  %v2125_v56 = vld [vmem:[%s3033_s12 + $0x34] ss:$8 sps:$4 sm:$0xff]   ;;  %v2123_v57 = vld [vmem:[%s3033_s12 + $0x30] ss:$8 sps:$4 sm:$0xff]  }
 0x1b9   : > { %602 = vmatpush1.bf16.msra.mxu0 %v2086_v29  ;;  %v2128_v58 = vld [vmem:[%s3033_s12 + $0x44] ss:$8 sps:$4 sm:$0xff]   ;;  %v2126_v59 = vld [vmem:[%s3033_s12 + $0x40] ss:$8 sps:$4 sm:$0xff]   ;;  %v2131_v60 = vld [vmem:[%s3033_s12 + $0x54] ss:$8 sps:$4 sm:$0xff]  }
 0x1ba   : > { %603 = vmatprep.subr.bf16.mxu0 %v2090_v30  ;;  %v2129_v61 = vld [vmem:[%s3033_s12 + $0x50] ss:$8 sps:$4 sm:$0xff]   ;;  %v2134_v62 = vld [vmem:[%s3033_s12 + $0x64] ss:$8 sps:$4 sm:$0xff]   ;;  %v2132_v63 = vld [vmem:[%s3033_s12 + $0x60] ss:$8 sps:$4 sm:$0xff]  }
 0x1bb   : > { %739 = vmatpush1.bf16.msra.mxu1 %v2089_v32  ;;  %2050 = vset.pattern.permute.xlu0 %v2512_v37  ;;  %v2137_v1 = vld [vmem:[%s3033_s12 + $0x74] ss:$8 sps:$4 sm:$0xff]   ;;  %v2135_v2 = vld [vmem:[%s3033_s12 + $0x70] ss:$8 sps:$4 sm:$0xff]   ;;  %v2513_v3 = vmov 12   ;;  %v2514_v4 = vmov 11  }
 0x1bc   : > { %740 = vmatprep.subr.bf16.mxu1 %v2093_v33  ;;  %1085 = vperm.xlu0 %2050, %v3049_v0   ;;  %p910_p5 = scmp.gt.s32.totalorder %s3614_s14, 0  ;;  %s2515_s6 = smov 1   ;;  %v2517_v16 = vmov 14   ;;  %v2518_v17 = vmov 13   ;;  %v2519_v23 = vmov 2   ;;  %v2520_v26 = vmov 15  }
 0x1bd   : > { %604 = vmatpush1.bf16.msra.mxu0 %v2092_v34  ;;  %2052 = vset.pattern.permute.xlu1 %v2514_v4  ;;  %s2516_s22 = smov 127   ;;  %p916_p11 = scmp.lt.s32.totalorder %s3614_s14, 3  ;;  %v2521_v27 = vmov 17   ;;  %v2522_v28 = vmov 16   ;;  %v2523_v29 = vmov 18   ;;  %v2524_v30 = vmov 20  }
 0x1be   : > { %605 = vmatprep.subr.bf16.mxu0 %v2096_v35  ;;  %s911_s15 = scalar_select %p910_p5, 1, 0  ;;  %v2525_v31 = vmov 19   ;;  %v2526_v32 = vmov 22   ;;  %vm989_vm1 = vcmask 7168   ;;  %vm1020_vm4 = vcmask 1039360  }
 0x1bf   : > { %741 = vmatpush1.bf16.msra.mxu1 %v2095_v36  ;;  %s917_s21 = scalar_select %p916_p11, 1, 0 }
 0x1c0   : > { %742 = vmatprep.subr.bf16.mxu1 %v2099_v38  ;;  %2053 = vset.pattern.permute.xlu0 %v2513_v3  ;;  %s912_s16 = scvt.s32.f32 %s911_s15  ;;  %p1187_p10 = scmp.eq.s32.totalorder %s3614_s14, 3 }
 0x1c1   : > { %606 = vmatpush1.bf16.msra.mxu0 %v2098_v39  ;;  %s918_s20 = scvt.s32.f32 %s917_s21  ;;  %v922_v39 = vlaneseq  ;;  %p1814_p2 = scmp.ne.s32.totalorder %s3614_s14, 3 }
 0x1c2   : > { %607 = vmatprep.subr.bf16.mxu0 %v2102_v40  ;;  %v913_v7 = vstv %s912_s16  ;;  %s1188_s8 = scalar_select %p1187_p10, 1, 0 }
 0x1c3   : > { %743 = vmatpush1.bf16.msra.mxu1 %v2101_v41  ;;  %v919_v18 = vstv %s918_s20  ;;  %s1180_s5 = scalar_select %p479_p8, 1, 0 }
 0x1c4   : > { %744 = vmatprep.subr.bf16.mxu1 %v2105_v42  ;;  %v3174_v42 = vand.u32 127, %v922_v39  ;;  %s1189_s27 = scvt.s32.f32 %s1188_s8 }
 0x1c5   : > { %608 = vmatpush1.bf16.msra.mxu0 %v2104_v43  ;;  %s1181_s17 = scvt.s32.f32 %s1180_s5 }
 0x1c6   : > { %609 = vmatprep.subr.bf16.mxu0 %v2108_v44  ;;  %v924_v43 = vadd.s32 128, %v3174_v42  ;;  %v925_v44 = vadd.s32 256, %v3174_v42  ;;  %vm935_vm0 = vcmp.ne.s32.totalorder %v3174_v42, 0  ;;  %vm953_vm2 = vcmp.ne.s32.totalorder %v3174_v42, 127 }
 0x1c7   : > { %745 = vmatpush1.bf16.msra.mxu1 %v2107_v45 }
 0x1c8   : > { %746 = vmatprep.subr.bf16.mxu1 %v2111_v46  ;;  %v3182_v46 = vadd.s32 384, %v3174_v42 }
 0x1c9   : > { %610 = vmatpush1.bf16.msra.mxu0 %v2110_v47 }
 0x1ca   : > { %869 = vmatprep.subr.bf16.mxu0 %v2116_v48  ;;  %v930_v48 = vand.u32 127, %v924_v43 }
 0x1cb   : > { %747 = vmatpush1.bf16.msra.mxu1 %v2113_v49  ;;  %v2527_v49 = vmov 0.0  }
 0x1cc   : > { %628 = vmatmul.mubr.bf16.vlgmr.msra.gmra.mrb[0].mxu0 %v498_v50  ;;  %vm954_vm3 = vcmp.ne.s32.totalorder %v930_v48, 127  ;;  %vm936_vm6 = vcmp.ne.s32.totalorder %v930_v48, 0 }
 0x1cd   : > { %870 = vmatpush1.bf16.msra.mxu0 %v2114_v51  ;;  %901 = vmatprep.mubr.bf16.mxu0 %v2506_v12  ;;  %v931_v51 = vand.u32 127, %v925_v44  ;;  %v3211_v3 = vsel %vm936_vm6, 1.0, %v2527_v49 }
 0x1ce   : > { %765 = vmatmul.mubr.bf16.vlgmr.msra.gmra.mrb[0].mxu1 %v498_v50  ;;  %871 = vmatprep.subr.bf16.mxu0 %v2119_v52 }
 0x1cf   : > { %vm955_vm5 = vcmp.ne.s32.totalorder %v931_v51, 127  ;;  %vm937_vm7 = vcmp.ne.s32.totalorder %v931_v51, 0 }
 0x1d0   : > { %v3214_v4 = vsel %vm937_vm7, 1.0, %v2527_v49 }
 0x1d1   : > { %872 = vmatpush1.bf16.msra.mxu0 %v2117_v53  ;;  %v932_v53 = vand.u32 127, %v3182_v46 }
 0x1d2   : > { %873 = vmatprep.subr.bf16.mxu0 %v2122_v54 }
 0x1d3   : > { %vm938_vm8 = vcmp.ne.s32.totalorder %v932_v53, 0  ;;  %vm956_vm10 = vcmp.ne.s32.totalorder %v932_v53, 127 }
 0x1d5   : > { %874 = vmatpush1.bf16.msra.mxu0 %v2120_v55 }
 0x1d6   : > { %875 = vmatprep.subr.bf16.mxu0 %v2125_v56 }
 0x1d9   : > { %876 = vmatpush1.bf16.msra.mxu0 %v2123_v57  ;;  %v3194_v57 = vsel %vm953_vm2, 1.0, %v2527_v49 }
 0x1da   : > { %877 = vmatprep.subr.bf16.mxu0 %v2128_v58 }
 0x1dd   : > { %878 = vmatpush1.bf16.msra.mxu0 %v2126_v59 }
 0x1de   : > { %879 = vmatprep.subr.bf16.mxu0 %v2131_v60  ;;  %v3200_v60 = vsel %vm954_vm3, 1.0, %v2527_v49 }
 0x1e1   : > { %880 = vmatpush1.bf16.msra.mxu0 %v2129_v61 }
 0x1e2   : > { %881 = vmatprep.subr.bf16.mxu0 %v2134_v62 }
 0x1e5   : > { %882 = vmatpush1.bf16.msra.mxu0 %v2132_v63 }
 0x1e6   : > { %883 = vmatprep.subr.bf16.mxu0 %v2137_v1  ;;  %v3206_v1 = vsel %vm955_vm5, 1.0, %v2527_v49 }
 0x1e9   : > { %884 = vmatpush1.bf16.msra.mxu0 %v2135_v2 }
 0x1ec   : > { %902 = vmatmul.mubr.bf16.vlgmr.msra.gmra.mrb[4].mxu0 %v498_v50  ;;  %v3187_v50 = vsel %vm935_vm0, 1.0, %v2527_v49 }
 0x22c   : > { %v3162_v33 = vpop.permute.xlu0 %1041 }
 0x22f   : > { %v3164_v34 = vpop.permute.xlu1 %1061 }
 0x231   : > { %v3166_v35 = vpop.permute.xlu0 %1049 }
 0x234   : > { %v3168_v36 = vpop.permute.xlu1 %1097 }
 0x236   : > { %v3170_v37 = vpop.permute.xlu0 %1073 }
 0x23b   : > { %v3172_v41 = vpop.permute.xlu0 %1085 }
 0x29f   : > { %v3115_v5 = vpop.f32.mrb[0].mxu0 }
 0x2a0   : > { %981 = vrot.lane.b32.xlu1 %v3115_v5, %s2515_s6  ;;  %v3119_v6 = vpop.f32.mrb[1].mxu0 }
 0x2a1   : > { %v766_v8 = vpop.f32.mrb[0].mxu1  ;;  %983 = vrot.lane.b32.xlu0 %v3119_v6, %s2515_s6  ;;  %v633_v9 = vpop.f32.mrb[2].mxu0 }
 0x2a2   : > { %v634_v10 = vpop.f32.mrb[3].mxu0  ;;  %v768_v11 = vpop.f32.mrb[1].mxu1  ;;  %v3129_v15 = vmul.f32 %v913_v7, %v766_v8  ;;  %v3219_v8 = vsel %vm938_vm8, 1.0, %v2527_v49 }
 0x2a3   : > { %v3123_v12 = vmul.f32 %v913_v7, %v768_v11  ;;  %v770_v13 = vpop.f32.mrb[2].mxu1 }
 0x2a4   : > { %1012 = vrot.lane.b32.xlu1 %v3115_v5, %s2516_s22  ;;  %v771_v14 = vpop.f32.mrb[3].mxu1  ;;  %v1052_v7 = vmul.f32 %v3166_v35, %v3129_v15 }
 0x2a5   : > { %1010 = vrot.lane.b32.xlu0 %v3123_v12, %s2516_s22 }
 0x2a8   : > { %1014 = vrot.lane.b32.xlu1 %v3119_v6, %s2516_s22 }
 0x2a9   : > { %1121 = vperm.xlu0 %2053, %v3049_v0  }
 0x2ac   : > { %977 = vrot.lane.b32.xlu1 %v3129_v15, %s2515_s6 }
 0x2ad   : > { %2056 = vset.pattern.permute.xlu0 %v2517_v16 }
 0x2b0   : > { %1008 = vrot.lane.b32.xlu1 %v3129_v15, %s2516_s22 }
 0x2b4   : > { %979 = vrot.lane.b32.xlu1 %v3123_v12, %s2515_s6 }
 0x2b8   : > { %1109 = vperm.xlu1 %2052, %v3049_v0  }
 0x2bc   : > { %2054 = vset.pattern.permute.xlu1 %v2518_v17 }
 0x2bd   : > { %1133 = vperm.xlu1 %2054, %v3049_v0  }
 0x2bf   : > { %v903_v19 = vpop.f32.mrb[4].mxu0 }
 0x2c0   : > { %v3143_v20 = vmul.f32 %v919_v18, %v903_v19  ;;  %v905_v21 = vpop.f32.mrb[5].mxu0 }
 0x2c1   : > { %v907_v22 = vpop.f32.mrb[6].mxu0  ;;  %2055 = vset.pattern.permute.xlu1 %v2519_v23  ;;  %v3149_v25 = vmul.f32 %v919_v18, %v905_v21  ;;  %v1054_v21 = vmul.f32 %v3166_v35, %v3115_v5 }
 0x2c2   : > { %985 = vrot.lane.b32.xlu0 %v3143_v20, %s2515_s6  ;;  %1016 = vrot.lane.b32.xlu1 %v3143_v20, %s2516_s22  ;;  %v908_v24 = vpop.f32.mrb[7].mxu0  ;;  %v1053_v22 = vmul.f32 %v3166_v35, %v3123_v12 }
 0x2c6   : > { %1145 = vperm.xlu1 %2055, %v3049_v0   ;;  %1018 = vrot.lane.b32.xlu0 %v3149_v25, %s2516_s22 }
 0x2ca   : > { %987 = vrot.lane.b32.xlu1 %v3149_v25, %s2515_s6  ;;  %1252 = vperm.xlu0 %2056, %v3049_v0  }
 0x2cb   : > { %2057 = vset.pattern.permute.xlu1 %v2520_v26 }
 0x2ce   : > { %1258 = vperm.xlu1 %2057, %v3049_v0   ;;  %2059 = vset.pattern.permute.xlu0 %v2521_v27 }
 0x2cf   : > { %1274 = vperm.xlu0 %2059, %v3049_v0  }
 0x2d2   : > { %2058 = vset.pattern.permute.xlu1 %v2522_v28 }
 0x2d3   : > { %2060 = vset.pattern.permute.xlu0 %v2523_v29  ;;  %1266 = vperm.xlu1 %2058, %v3049_v0   ;;  %v1088_v29 = vmul.f32 %v3172_v41, %v3123_v12  ;;  %v1090_v12 = vmul.f32 %v3172_v41, %v3119_v6 }
 0x2d4   : > { %1282 = vperm.xlu0 %2060, %v3049_v0  }
 0x2d7   : > { %2062 = vset.pattern.permute.xlu1 %v2524_v30 }
 0x2d8   : > { %1298 = vperm.xlu1 %2062, %v3049_v0   ;;  %2061 = vset.pattern.permute.xlu0 %v2525_v31 }
 0x2dc   : > { %2064 = vset.pattern.permute.xlu1 %v2526_v32 }
 0x312   : > { %v982_v38 = vpop.permute.xlu1 %981 }
 0x313   : > { %v3184_v47 = vpop.permute.xlu0 %983 }
 0x314   : > { %v992_v9 = vsel %vm989_vm1, %v982_v38, %v3184_v47 }
 0x315   : > { %v1005_v23 = vmul.f32 %v3219_v8, %v992_v9 }
 0x316   : > { %v1013_v40 = vpop.permute.xlu1 %1012 }
 0x317   : > { %v1011_v56 = vpop.permute.xlu0 %1010 }
 0x318   : > { %v1022_v61 = vsel %vm1020_vm4, %v1011_v56, %v1013_v40 }
 0x319   : > { %v1034_v13 = vmul.f32 %v3200_v60, %v1022_v61 }
 0x31a   : > { %v3178_v45 = vpop.permute.xlu1 %1014 }
 0x31b   : > { %v1023_v2 = vsel %vm1020_vm4, %v1013_v40, %v3178_v45  ;;  %v1065_v30 = vmul.f32 %v3164_v34, %v1034_v13  ;;  %v1078_v40 = vmul.f32 %v3170_v37, %v1005_v23  ;;  %v1100_v61 = vmul.f32 %v3168_v36, %v1034_v13 }
 0x31c   : > { %v1035_v17 = vmul.f32 %v3206_v1, %v1023_v2 }
 0x31e   : > { %v978_v52 = vpop.permute.xlu1 %977  ;;  %v1066_v31 = vmul.f32 %v3164_v34, %v1035_v17 }
 0x31f   : > { %v1001_v54 = vsel %vm989_vm1, 0.0, %v978_v52 }
 0x320   : > { %v1002_v55 = vmul.f32 %v3187_v50, %v1001_v54 }
 0x322   : > { %v1009_v58 = vpop.permute.xlu1 %1008  ;;  %v1044_v62 = vmul.f32 %v3162_v33, %v1002_v55 }
 0x323   : > { %v1021_v59 = vsel %vm1020_vm4, %v1009_v58, %v1011_v56 }
 0x324   : > { %v1033_v63 = vmul.f32 %v3194_v57, %v1021_v59  ;;  %v1056_v18 = vadd.f32 %v1052_v7, %v1044_v62  ;;  %v927_v59 = vadd.s32 512, %v3174_v42  ;;  %v1101_v62 = vmul.f32 %v3168_v36, %v1035_v17 }
 0x326   : > { %v1064_v10 = vmul.f32 %v3164_v34, %v1033_v63  ;;  %v980_v11 = vpop.permute.xlu1 %979  ;;  %v933_v2 = vand.u32 127, %v927_v59 }
 0x327   : > { %v990_v14 = vsel %vm989_vm1, %v978_v52, %v980_v11  ;;  %v991_v16 = vsel %vm989_vm1, %v980_v11, %v982_v38  ;;  %v1089_v52 = vmul.f32 %v3172_v41, %v3115_v5 }
 0x328   : > { %v1003_v15 = vmul.f32 %v3211_v3, %v990_v14  ;;  %v1004_v19 = vmul.f32 %v3214_v4, %v991_v16  ;;  %v1068_v24 = vadd.f32 %v1064_v10, %v1056_v18  ;;  %v3252_v63 = vpop.permute.xlu0 %1121  ;;  %v928_v16 = vadd.s32 640, %v3174_v42 }
 0x329   : > { %v1124_v13 = vmul.f32 %v3252_v63, %v3115_v5  ;;  %v1125_v18 = vmul.f32 %v3252_v63, %v3119_v6  ;;  %vm939_vm9 = vcmp.ne.s32.totalorder %v933_v2, 0  ;;  %vm957_vm11 = vcmp.ne.s32.totalorder %v933_v2, 127 }
 0x32a   : > { %v1045_v26 = vmul.f32 %v3162_v33, %v1003_v15  ;;  %v1046_v27 = vmul.f32 %v3162_v33, %v1004_v19  ;;  %v1076_v28 = vmul.f32 %v3170_v37, %v1003_v15  ;;  %v1077_v48 = vmul.f32 %v3170_v37, %v1004_v19 }
 0x32b   : > { %v1790_v42 = vsel %vm939_vm9, 1.0, %v2527_v49 }
 0x32c   : > { %v1057_v32 = vadd.f32 %v1053_v22, %v1045_v26  ;;  %v1058_v38 = vadd.f32 %v1054_v21, %v1046_v27  ;;  %v1080_v39 = vadd.f32 %v1076_v28, %v1068_v24  ;;  %v3269_v27 = vstv %s1189_s27 }
 0x32d   : > { %v934_v28 = vand.u32 127, %v928_v16  ;;  %v1191_v46 = vmul.f32 0.0, %v3269_v27 }
 0x32e   : > { %v1069_v43 = vadd.f32 %v1065_v30, %v1057_v32  ;;  %v1070_v44 = vadd.f32 %v1066_v31, %v1058_v38  ;;  %v1092_v51 = vadd.f32 %v1088_v29, %v1080_v39  ;;  %v1047_v29 = vmul.f32 %v3162_v33, %v1005_v23 }
 0x32f   : > { %v3276_v30 = vsel %vm956_vm10, 1.0, %v2527_v49  ;;  %v1182_v32 = vstv %s1181_s17  ;;  %v1055_v38 = vmul.f32 %v3166_v35, %v3119_v6  ;;  %vm3284_vm12 = vcmp.ne.s32.totalorder %v934_v28, 127 }
 0x330   : > { %v1081_v54 = vadd.f32 %v1077_v48, %v1069_v43  ;;  %v1082_v55 = vadd.f32 %v1078_v40, %v1070_v44  ;;  %v1104_v9 = vadd.f32 %v1100_v61, %v1092_v51  ;;  %v3291_v48 = vmul.f32 0.0, %v1182_v32 }
 0x331   : > { %v1059_v44 = vadd.f32 %v1055_v38, %v1047_v29  ;;  %vm3293_vm13 = vcmp.ne.s32.totalorder %v934_v28, 0  ;;  %v1195_v35 = vadd.f32 %v1191_v46, %v1182_v32 }
 0x332   : > { %v1093_v56 = vadd.f32 %v1089_v52, %v1081_v54  ;;  %v1094_v58 = vadd.f32 %v1090_v12, %v1082_v55  ;;  %v1091_v54 = vmul.f32 %v3172_v41, %v3143_v20 }
 0x333   : > { %v1199_v41 = vsub.f32 1.0, %v1195_v35  ;;  %v1198_v35 = vadd.f32 %v3269_v27, %v3291_v48  ;;  %v2145_v27 = vld [vmem:[%s3039_s29 + $0x18] sm:$0xff]  }
 0x334   : > { %v1105_v10 = vadd.f32 %v1101_v62, %v1093_v56  ;;  %v986_v22 = vpop.permute.xlu0 %985 }
 0x335   : > { %v993_v5 = vsel %vm989_vm1, %v3184_v47, %v986_v22 }
 0x336   : > { %v1006_v39 = vmul.f32 %v1790_v42, %v993_v5 }
 0x337   : > { %v3254_v7 = vpop.permute.xlu1 %1109 }
 0x338   : > { %v1112_v11 = vmul.f32 %v3254_v7, %v1004_v19  ;;  %v1113_v14 = vmul.f32 %v3254_v7, %v1005_v23  ;;  %v1019_v40 = vpop.permute.xlu0 %1018  ;;  %v1796_v23 = vsel %vm957_vm11, 1.0, %v2527_v49  ;;  %v1079_v55 = vmul.f32 %v3170_v37, %v1006_v39 }
 0x339   : > { %v1114_v56 = vmul.f32 %v3254_v7, %v1006_v39 }
 0x33a   : > { %v1116_v15 = vadd.f32 %v1112_v11, %v1104_v9  ;;  %v1117_v21 = vadd.f32 %v1113_v14, %v1105_v10  ;;  %v1196_v11 = vadd.f32 %v1191_v46, %v3291_v48  ;;  %v1791_v14 = vsel %vm3293_vm13, 1.0, %v2527_v49  ;;  %v2146_v48 = vld [vmem:[%s3039_s29 + $0x60] sm:$0xff]  }
 0x33c   : > { %v3265_v24 = vpop.permute.xlu1 %1133  ;;  %v1128_v19 = vadd.f32 %v1124_v13, %v1116_v15  ;;  %v1129_v26 = vadd.f32 %v1125_v18, %v1117_v21  ;;  %v1032_v15 = vsel %vm1020_vm4, %v1019_v40, 0.0  ;;  %v1200_v28 = vsub.f32 1.0, %v1196_v11 }
 0x33d   : > { %v1136_v53 = vmul.f32 %v3265_v24, %v1035_v17 }
 0x33f   : > { %v1140_v12 = vadd.f32 %v1136_v53, %v1128_v19 }
 0x340   : > { %v1017_v31 = vpop.permute.xlu1 %1016 }
 0x341   : > { %v1024_v47 = vsel %vm1020_vm4, %v3178_v45, %v1017_v31  ;;  %v1025_v43 = vsel %vm1020_vm4, %v1017_v31, %v1019_v40 }
 0x342   : > { %v1036_v17 = vmul.f32 %v3276_v30, %v1024_v47  ;;  %v1037_v59 = vmul.f32 %v1796_v23, %v1025_v43  ;;  %v2138_v47 = vld [vmem:[%s3039_s29 + $0x40] sm:$0xff]  }
 0x343   : > { %1819 = vmatprep.subr.bf16.mxu1 %v2138_v47 }
 0x344   : > { %v1067_v45 = vmul.f32 %v3164_v34, %v1036_v17  ;;  %v1102_v51 = vmul.f32 %v3168_v36, %v1036_v17  ;;  %v1137_v52 = vmul.f32 %v3265_v24, %v1036_v17  ;;  %v1126_v34 = vmul.f32 %v3252_v63, %v3143_v20 }
 0x345   : > { %v1146_v61 = vpop.permute.xlu1 %1145  ;;  %v1103_v21 = vmul.f32 %v3168_v36, %v1037_v59  ;;  %v1138_v42 = vmul.f32 %v3265_v24, %v1037_v59  ;;  %v1127_v36 = vmul.f32 %v3252_v63, %v3149_v25  ;;  %v2140_v63 = vld [vmem:[%s3039_s29 + $0x48] sm:$0xff]   ;;  %v2528_v17 = vmov 21   ;;  %v2147_v59 = vld [vmem:[%s3039_s29 + $0x20] sm:$0xff]  }
 0x346   : > { %v1071_v62 = vadd.f32 %v1067_v45, %v1059_v44  ;;  %v1106_v2 = vadd.f32 %v1102_v51, %v1094_v58  ;;  %v1141_v9 = vadd.f32 %v1137_v52, %v1129_v26  ;;  %v1148_v10 = vadd.f32 %v1146_v61, %v1140_v12  ;;  %v2142_v45 = vld [vmem:[%s3039_s29 + $0x50] sm:$0xff]  }
 0x347   : > { %v1797_v58 = vsel %vm3284_vm12, 1.0, %v2527_v49  ;;  %v2143_v51 = vld [vmem:[%s3039_s29 + $0x10] sm:$0xff]   ;;  %v2529_v52 = vmov 3  }
 0x348   : > { %v1083_v16 = vadd.f32 %v1079_v55, %v1071_v62  ;;  %v1118_v37 = vadd.f32 %v1114_v56, %v1106_v2  ;;  %v1149_v13 = vadd.f32 %v1146_v61, %v1141_v9  ;;  %v1152_v18 = vmax.f32 %v1148_v10, 0.0  ;;  %v2144_v55 = vld [vmem:[%s3039_s29 + $0x58] sm:$0xff]   ;;  %v2149_v62 = vld [vmem:[%s3039_s29 + $0x28] sm:$0xff]   ;;  %v2150_v2 = vld [vmem:[%s3039_s29 + $0x70] sm:$0xff]  }
 0x349   : > { %v988_v20 = vpop.permute.xlu1 %987  ;;  %v1038_v32 = vmul.f32 %v1797_v58, %v1032_v15  ;;  %v2151_v9 = vld [vmem:[%s3039_s29 + $0x30] sm:$0xff]   ;;  %v2152_v10 = vld [vmem:[%s3039_s29 + $0x78] sm:$0xff]   ;;  %v1253_v11 = vpop.permute.xlu0 %1252 }
 0x34a   : > { %v1095_v19 = vadd.f32 %v1091_v54, %v1083_v16  ;;  %v1130_v26 = vadd.f32 %v1126_v34, %v1118_v37  ;;  %v994_v5 = vsel %vm989_vm1, %v986_v22, %v988_v20  ;;  %v1153_v29 = vmax.f32 %v1149_v13, 0.0  ;;  %v2153_v34 = vld [vmem:[%s3039_s29 + $0x38] sm:$0xff]  }
 0x34b   : > { %v1007_v46 = vmul.f32 %v1791_v14, %v994_v5  ;;  %v3317_v53 = vmul.f32 %v1199_v41, %v1152_v18  ;;  %v1139_v33 = vmul.f32 %v3265_v24, %v1038_v32  ;;  %v2141_v24 = vld [vmem:[%s3039_s29 + $0x8] sm:$0xff]   ;;  %v1202_v54 = vsub.f32 1.0, %v1198_v35 }
 0x34c   : > { %v1107_v31 = vadd.f32 %v1103_v21, %v1095_v19  ;;  %v1142_v49 = vadd.f32 %v1138_v42, %v1130_v26  ;;  %v3326_v39 = vmul.f32 %v1200_v28, %v1153_v29 }
 0x34d   : > { %v1115_v38 = vmul.f32 %v3254_v7, %v1007_v46  ;;  %1231 = vrot.lane.b32.xlu1 %v3317_v53, %s2516_s22  ;;  %1211 = vrot.lane.b32.xlu0 %v3317_v53, %s2515_s6  ;;  %v2139_v7 = vld [vmem:[%s3039_s29] sm:$0xff]   ;;  %v1259_v14 = vpop.permute.xlu1 %1258 }
 0x34e   : > { %v1150_v22 = vadd.f32 %v1146_v61, %v1142_v49  ;;  %1820 = vmatpush3.bf16.msra.mxu1 %v2139_v7  ;;  %v1275_v16 = vpop.permute.xlu0 %1274 }
 0x34f   : > { %v1119_v40 = vadd.f32 %v1115_v38, %v1107_v31  ;;  %1821 = vmatprep.subr.bf16.mxu1 %v2140_v63 }
 0x350   : > { %v1154_v43 = vmax.f32 %v1150_v22, 0.0 }
 0x351   : > { %v1131_v23 = vadd.f32 %v1127_v36, %v1119_v40  ;;  %1213 = vrot.lane.b32.xlu1 %v3326_v39, %s2515_s6  ;;  %1290 = vperm.xlu0 %2061, %v3049_v0  }
 0x352   : > { %v3339_v44 = vmul.f32 %v1200_v28, %v1154_v43  ;;  %1822 = vmatpush3.bf16.msra.mxu1 %v2141_v24  ;;  %v1267_v41 = vpop.permute.xlu1 %1266  ;;  %v1261_v28 = vmul.f32 %v1259_v14, %v3317_v53  ;;  %v1262_v43 = vmul.f32 %v1259_v14, %v3326_v39 }
 0x353   : > { %v1143_v25 = vadd.f32 %v1139_v33, %v1131_v23  ;;  %1823 = vmatprep.subr.bf16.mxu1 %v2142_v45  ;;  %v1283_v13 = vpop.permute.xlu0 %1282 }
 0x354   : > { %v1285_v22 = vmul.f32 %v1283_v13, %v3326_v39 }
 0x355   : > { %1233 = vrot.lane.b32.xlu1 %v3326_v39, %s2516_s22  ;;  %2063 = vset.pattern.permute.xlu0 %v2528_v17  ;;  %v1151_v6 = vadd.f32 %v1146_v61, %v1143_v25  ;;  %v2148_v61 = vld [vmem:[%s3039_s29 + $0x68] sm:$0xff]  }
 0x356   : > { %1306 = vperm.xlu0 %2063, %v3049_v0   ;;  %1824 = vmatpush3.bf16.msra.mxu1 %v2143_v51 }
 0x357   : > { %v1155_v12 = vmax.f32 %v1151_v6, 0.0  ;;  %1825 = vmatprep.subr.bf16.mxu1 %v2144_v55  ;;  %v1299_v37 = vpop.permute.xlu1 %1298 }
 0x359   : > { %1235 = vrot.lane.b32.xlu1 %v3339_v44, %s2516_s22  ;;  %v3353_v56 = vmul.f32 %v1202_v54, %v1155_v12  ;;  %v1286_v12 = vmul.f32 %v1283_v13, %v3339_v44 }
 0x35a   : > { %2065 = vset.pattern.permute.xlu0 %v2529_v52  ;;  %1826 = vmatpush3.bf16.msra.mxu1 %v2145_v27 }
 0x35b   : > { %1322 = vperm.xlu0 %2065, %v3049_v0   ;;  %1827 = vmatprep.subr.bf16.mxu1 %v2146_v48 }
 0x35d   : > { %1215 = vrot.lane.b32.xlu1 %v3339_v44, %s2515_s6 }
 0x35e   : > { %1828 = vmatpush3.bf16.msra.mxu1 %v2147_v59 }
 0x35f   : > { %1829 = vmatprep.subr.bf16.mxu1 %v2148_v61 }
 0x361   : > { %1237 = vrot.lane.b32.xlu1 %v3353_v56, %s2516_s22 }
 0x362   : > { %1830 = vmatpush3.bf16.msra.mxu1 %v2149_v62 }
 0x363   : > { %1831 = vmatprep.subr.bf16.mxu1 %v2150_v2 }
 0x365   : > { %1217 = vrot.lane.b32.xlu1 %v3353_v56, %s2515_s6 }
 0x366   : > { %1832 = vmatpush3.bf16.msra.mxu1 %v2151_v9 }
 0x367   : > { %1833 = vmatprep.subr.bf16.mxu1 %v2152_v10 }
 0x369   : > { %1314 = vperm.xlu1 %2064, %v3049_v0  }
 0x36a   : > { %1834 = vmatpush3.bf16.msra.mxu1 %v2153_v34 }
 0x3bf   : > { %v1232_v18 = vpop.permute.xlu1 %1231  ;;  %v1212_v58 = vpop.permute.xlu0 %1211 }
 0x3c0   : > { %v1226_v15 = vsel %vm989_vm1, 0.0, %v1212_v58 }
 0x3c1   : > { %v1227_v21 = vmul.f32 %v3187_v50, %v1226_v15 }
 0x3c3   : > { %v1214_v20 = vpop.permute.xlu1 %1213  ;;  %v1255_v26 = vmul.f32 %v1253_v11, %v1227_v21 }
 0x3c4   : > { %v1219_v19 = vsel %vm989_vm1, %v1212_v58, %v1214_v20 }
 0x3c5   : > { %v1228_v29 = vmul.f32 %v3211_v3, %v1219_v19  ;;  %v1263_v31 = vadd.f32 %v1261_v28, %v1255_v26  ;;  %v1329_v26 = vld [vmem:[#allocation2] sm:$0xff] }
 0x3c7   : > { %v1234_v42 = vpop.permute.xlu1 %1233  ;;  %v1277_v38 = vmul.f32 %v1275_v16, %v1228_v29  ;;  %v1256_v7 = vmul.f32 %v1253_v11, %v1228_v29  ;;  %v2530_v29 = vmov (!%p1814_p2), 4  }
 0x3c8   : > { %v1239_v5 = vsel %vm1020_vm4, %v1232_v18, %v1234_v42  ;;  %2154 = vset.pattern.permute.xlu0 (!%p1814_p2), %v2530_v29 }
 0x3c9   : > { %v1247_v46 = vmul.f32 %v3194_v57, %v1239_v5  ;;  %v1264_v63 = vadd.f32 %v1262_v43, %v1256_v7  ;;  %1506 = vperm.xlu0 (!%p1814_p2), %2154, %v3049_v0  }
 0x3cb   : > { %v1269_v49 = vmul.f32 %v1267_v41, %v1247_v46  ;;  %v1236_v32 = vpop.permute.xlu1 %1235 }
 0x3cc   : > { %v1240_v50 = vsel %vm1020_vm4, %v1234_v42, %v1236_v32 }
 0x3cd   : > { %v1271_v36 = vadd.f32 %v1269_v49, %v1263_v31  ;;  %v1248_v23 = vmul.f32 %v3200_v60, %v1240_v50  ;;  %v1503_v49 = vld [vmem:[%s3011_s30] sm:$0xff] (!%p1814_p2) }
 0x3cf   : > { %v1216_v40 = vpop.permute.xlu1 %1215  ;;  %v1279_v47 = vadd.f32 %v1277_v38, %v1271_v36  ;;  %v1270_v25 = vmul.f32 %v1267_v41, %v1248_v23 }
 0x3d0   : > { %v1220_v33 = vsel %vm989_vm1, %v1214_v20, %v1216_v40  ;;  %v1291_v45 = vpop.permute.xlu0 %1290 }
 0x3d1   : > { %v1287_v53 = vadd.f32 %v1285_v22, %v1279_v47  ;;  %v1229_v3 = vmul.f32 %v3214_v4, %v1220_v33  ;;  %v1272_v35 = vadd.f32 %v1270_v25, %v1264_v63  ;;  %v1293_v54 = vmul.f32 %v1291_v45, %v1248_v23 }
 0x3d3   : > { %v1238_v57 = vpop.permute.xlu1 %1237  ;;  %v1278_v17 = vmul.f32 %v1275_v16, %v1229_v3  ;;  %v1301_v27 = vmul.f32 %v1299_v37, %v1229_v3  ;;  %v1295_v48 = vadd.f32 %v1293_v54, %v1287_v53 }
 0x3d4   : > { %v1241_v6 = vsel %vm1020_vm4, %v1236_v32, %v1238_v57  ;;  %v1246_v2 = vsel %vm1020_vm4, %v1238_v57, 0.0 }
 0x3d5   : > { %v1280_v52 = vadd.f32 %v1278_v17, %v1272_v35  ;;  %v1249_v60 = vmul.f32 %v3206_v1, %v1241_v6  ;;  %v1307_v61 = vpop.permute.xlu0 %1306  ;;  %v1303_v9 = vadd.f32 %v1301_v27, %v1295_v48  ;;  %v1250_v11 = vmul.f32 %v3276_v30, %v1246_v2 }
 0x3d6   : > { %v1309_v10 = vmul.f32 %v1307_v61, %v3339_v44  ;;  %v1310_v1 = vmul.f32 %v1307_v61, %v3353_v56 }
 0x3d7   : > { %v1218_v24 = vpop.permute.xlu1 %1217  ;;  %v1288_v55 = vadd.f32 %v1286_v12, %v1280_v52  ;;  %v1294_v39 = vmul.f32 %v1291_v45, %v1249_v60 }
 0x3d8   : > { %v1221_v51 = vsel %vm989_vm1, %v1216_v40, %v1218_v24  ;;  %v1311_v41 = vadd.f32 %v1309_v10, %v1303_v9 }
 0x3d9   : > { %v1230_v4 = vmul.f32 %v3219_v8, %v1221_v51  ;;  %v1296_v62 = vadd.f32 %v1294_v39, %v1288_v55 }
 0x3da   : > { %v1323_v18 = vpop.permute.xlu0 %1322 }
 0x3db   : > { %v1302_v59 = vmul.f32 %v1299_v37, %v1230_v4 }
 0x3dd   : > { %v1304_v34 = vadd.f32 %v1302_v59, %v1296_v62 }
 0x3df   : > { %v1312_v13 = vadd.f32 %v1310_v1, %v1304_v34 }
 0x3e8   : > { %v1315_v14 = vpop.permute.xlu1 %1314 }
 0x3e9   : > { %v1317_v8 = vmul.f32 %v1315_v14, %v1249_v60  ;;  %v1318_v16 = vmul.f32 %v1315_v14, %v1250_v11 }
 0x3eb   : > { %v1319_v58 = vadd.f32 %v1317_v8, %v1311_v41  ;;  %v1320_v37 = vadd.f32 %v1318_v16, %v1312_v13 }
 0x3ed   : > { %v1325_v15 = vadd.f32 %v1323_v18, %v1319_v58  ;;  %v1326_v21 = vadd.f32 %v1323_v18, %v1320_v37 }
 0x3ef   : > { %v1327_v20 = vpack.c.bf16 %v1325_v15, %v1325_v15  ;;  %v1328_v19 = vpack.c.bf16 %v1326_v21, %v1326_v21 }
 0x3f1   : > { %1490 = vmatprep.mubr.bf16.mxu1 %v1328_v19 }
 0x3f2   : > { %1491 = vmatmul.mubr.bf16.vlgmr.msra.gmra.mrb[4].mxu1 %v1327_v20 }
 0x448   : > { %v1507_v31 = vpop.permute.xlu0 (!%p1814_p2), %1506 }
 0x4c5   : > { %v1835_v44 = vpop.f32.mrb[4].mxu1  ;;  %1502 = sbr.rel (%p1814_p2) target bundleno = 1240 (0x4d8), region = 72 }
 0x4c6   : > { %v1836_v42 = vpop.f32.mrb[5].mxu1 }
 0x4c7   : > { %v1837_v56 = vadd.f32 %v1836_v42, %v1835_v44  ;;  %v1838_v5 = vpop.f32.mrb[6].mxu1 }
 0x4c8   : > { %v1839_v30 = vpop.f32.mrb[7].mxu1 }
 0x4c9   : > { %v1498_v28 = vadd.f32 %v1837_v56, %v1329_v26 }
 0x4cb   : > { %1499 = vst [vmem:[#allocation2] sm:$0xff] %v1498_v28 }
 0x4d2   : > { %v1504_v46 = vld [vmem:[#allocation2] sm:$0xff] }
 0x4d3   : > { %v1509_v32 = vmul.f32 %v1507_v31, %v1504_v46 }
 0x4d5   : > { %v1510_v38 = vadd.f32 %v1509_v32, %v1503_v49 }
 0x4d7   : > { %1511 = vst [vmem:[%s3051_s23] sm:$0xff] %v1510_v38 }
 0x4d8 PF: > { %s3619_s19 = sld [smem:[#allocation28_spill]]  ;;  %s3620_s0 = sld [smem:[#allocation48_spill]] }
 0x4d9   : > { %s1526_s12 = sshll.u32 %s3051_s23, 4  ;;  %s1513_s29 = scalar_lea.sflag [#allocation6], %s3007_s3  ;;  %s1527_s12 = int_to_ptr.vmem [resolvable:$true] %s1526_s12 }
 0x4da   : > { %s2305_s9 = scalar_lea.vmem %s1527_s12, 128  ;;  %p3621_p0 = scmp.ne.s32.totalorder %s3583_s24, 0 }
 0x4db   : > { %p2306_p12 = scmp.ne.s32.totalorder %s1527_s12, %s2305_s9  ;;  %s2531_s30 = smov [#allocation13]  }
 0x4dc   : > { %s2309_s18 = sshll.u32 %s2531_s30, 4  ;;  %s2310_s18 = int_to_ptr.vmem [resolvable:$false] %s2309_s18 }
 0x4dd   : > { %p2307_p9 = pnand %p2306_p12, %p3621_p0  ;;  %s2311_s10 = scalar_lea.vmem %s2310_s18, 256 }
 0x4de   : > { %s1816_s2 = sshll.u32 %s3619_s19, 7  ;;  %p2312_p3 = scmp.lt.s32.totalorder %s1527_s12, %s2310_s18 }
 0x4df   : > { %s3397_s1 = scalar_lea.hbm %s3620_s0, %s1816_s2  ;;  %p2308_p13 = pneg %p2307_p9 }
 0x4e0   : > { %p2313_p7 = scmp.lt.s32.totalorder %s2311_s10, %s2305_s9 }
 0x4e2   : > { %p2314_p6 = por %p2313_p7, %p2312_p3 }
 0x4e4   : > { %p2315_p4 = pnand %p2314_p6, %p2308_p13 }
 0x4e6   : > { %2318 = shalt.err (!%p2315_p4)
}
 0x4e7   : > { %s2319_s3 = scalar_lea.hbm %s3397_s1, 128  ;;  %s2323_s14 = scalar_lea.hbm %s3620_s0, 256 }
 0x4e8   : > { %p2320_p8 = scmp.ne.s32.totalorder %s3397_s1, %s2319_s3  ;;  %p2324_p11 = scmp.lt.u32.totalorder %s3397_s1, %s3620_s0 }
 0x4e9   : > { %p2325_p10 = scmp.lt.u32.totalorder %s2323_s14, %s2319_s3  ;;  %p2327_p12 = scmp.lt.u32.totalorder %s2319_s3, %s3397_s1 }
 0x4ea   : > { %p2321_p1 = pnand %p2320_p8, %p3621_p0 }
 0x4eb   : > { %p2326_p2 = por %p2325_p10, %p2324_p11 }
 0x4ec   : > { %p2322_p5 = pneg %p2321_p1 }
 0x4ed   : > { %p2328_p9 = por %p2327_p12, %p2326_p2 }
 0x4ef   : > { %p2329_p13 = pnand %p2328_p9, %p2322_p5 }
 0x4f1   : > { %2332 = shalt.err (!%p2329_p13)
}
 0x4f2   : > { %1851 = dma.vmem_to_hbm [thread:$0]  (%p3621_p0), %s1527_s12, 128, %s3397_s1, %s1513_s29  }
 0x4f3 PF: > { %s3622_s6 = sld [smem:[#allocation31_spill]]  ;;  %s3623_s22 = sld [smem:[#allocation25_spill]] }
 0x4f4   : > { %s3624_s21 = sld [smem:[#allocation20_spill]] }
 0x4f9   : > { %p1874_p3 = scmp.ge.s32.totalorder %s3622_s6, 2  ;;  %s1538_s20 = sand.u32 1, %s3623_s22  }
 0x4fa   : > { %p3625_p7 = scmp.ne.s32.totalorder %s3624_s21, 0  ;;  %s1539_s8 = scalar_lea.sflag [#allocation6], %s1538_s20 }
 0x4fc   : > { %p1870_p6 = pnand %p1874_p3, %p3625_p7 }
 0x4fe   : > { %2422 = dma.done.wait (!%p1870_p6), %s1539_s8, 128  }
 0x4ff   : > { %2424 = vsyncadd (!%p1870_p6), %s1539_s8, 4294967168  ;;  %s28_s13 = sadd.s32 1, %s3622_s6   ;;  %s3627_s21 = sld [smem:[#allocation21_spill]] }
 0x500   : > { %p3423_p4 = scmp.ge.s32.totalorder %s28_s13, 10   ;;  %s3628_s22 = sld [smem:[#allocation22_spill]] }
 0x501   : > { %s3629_s23 = sld [smem:[#allocation39_spill]]  ;;  %s3631_s26 = sld [smem:[#allocation41_spill]] }
 0x502   : > { %s3630_s27 = sld [smem:[#allocation23_spill]]  ;;  %s3632_s17 = sld [smem:[#allocation24_spill]] }
 0x503   : > { %s3633_s29 = sld [smem:[#allocation38_spill]]  ;;  %s3634_s19 = sld [smem:[#allocation26_spill]] }
 0x504   : > { %s3635_s8 = sld [smem:[#allocation40_spill]]  ;;  %s3636_s9 = sld [smem:[#allocation29_spill]] }
 0x505   : > { %s3637_s10 = sld [smem:[#allocation30_spill]]  ;;  %s3638_s11 = sld [smem:[#allocation36_spill]] }
 0x506   : > { %s3639_s12 = sld [smem:[#allocation37_spill]]  ;;  %s3640_s24 = smov %s2443_s25 }
 0x507   : > { %s3644_s30 = smov %s2467_s7  ;;  %27 = sbr.rel (!%p3423_p4) target bundleno = 24 (0x18), region = 145 }
 0x508   : > { %s3641_s25 = smov %s3630_s27  ;;  %s3642_s27 = smov %s2455_s28 }
 0x509   : > { %s3643_s28 = smov %s3632_s17  ;;  %s3645_s7 = smov %s3634_s19 }
 0x50e   :  { %1544 = vsyncpa [#allocation5], 1 }
 0x50f   :  { %1546 = vsyncpa [#allocation5 + $0x1], 1 }
 0x510   :  { %1547 = vsyncpa [#allocation8], 1 }
 0x511   :  { %1549 = vsyncpa [#allocation8 + $0x1], 1 }
 0x512   :  { %1550 = vsyncpa [#allocation11], 1 }
 0x513   :  { %1552 = vsyncpa [#allocation11 + $0x1], 1 }
 0x514   :  { %1553 = vsyncpa [#allocation6], 1 }
 0x515   :  { %1555 = vsyncpa [#allocation6 + $0x1], 1 }

</bundles_post_ra>
